<compile_context>
chip_gen: v7x
topology: tpu7x:2x2x1
jax: 0.10.0
libtpu: 0.0.40
codegen_flags: <defaults>
</compile_context>

<pallas_src>
import functools
import math

import jax
import jax.numpy as jnp
import numpy as np
from jax.experimental import pallas as pl
from jax.experimental.pallas import tpu as pltpu

HIDDEN_SIZE = 200    # args.hidden_size (logical)
HIDDEN_PAD = 256     # lane-aligned padded hidden size used inside the kernel
LSTM_SIZE = 128      # args.lstm_size
HEAD_PAD = 128       # lane-dense packed head output width


def actor_critic_kernel(
    states_ref,      # (B, num_inputs)
    h0_ref,          # (B, 4*L)  = [a_h0 | a_c0 | c_h0 | c_c0]
    fc1_w_ref,       # (num_inputs, 2*HP)  = [actor fc1 | critic fc1] (zero padded)
    fc1_b_ref,       # (1, 2*HP)
    wih_ref,         # (2, HP, 4*L)        (rows >= 200 are zero)
    whh_ref,         # (2, L, 4*L)
    gate_b_ref,      # (1, 2*4*L)          (bih + bhh per branch)
    head_w_ref,      # (2*L, HEAD_PAD)     rows 0:L -> mu|sig, rows L:2L -> value
    head_b_ref,      # (1, HEAD_PAD)
    head_out_ref,    # (B, HEAD_PAD)       [mean | std | value | 0...]
    h1_ref,          # (B, 4*L)            [a_h1 | a_c1 | c_h1 | c_c1]
    *,
    num_outputs: int,
):
    L = LSTM_SIZE
    HP = HIDDEN_PAD

    x = states_ref[...]            # (B, num_inputs)
    h0 = h0_ref[...]               # (B, 4*L)  (read fully before any output write)

    # Fused fc1 + ReLU for both branches: (B, 2*HP).  Padded columns stay 0.
    h = jnp.dot(x, fc1_w_ref[...], preferred_element_type=jnp.float32) + fc1_b_ref[...]
    h = jnp.maximum(h, 0.0)

    def lstm_step(branch, h_fc, h_prev, c_prev):
        gates = (
            jnp.dot(h_fc, wih_ref[branch], preferred_element_type=jnp.float32)
            + jnp.dot(h_prev, whh_ref[branch], preferred_element_type=jnp.float32)
            + gate_b_ref[:, branch * 4 * L:(branch + 1) * 4 * L]
        )
        # PyTorch LSTM gate order: i, f, g, o
        i_g = jax.nn.sigmoid(gates[:, 0 * L:1 * L])
        f_g = jax.nn.sigmoid(gates[:, 1 * L:2 * L])
        g_g = jnp.tanh(gates[:, 2 * L:3 * L])
        o_g = jax.nn.sigmoid(gates[:, 3 * L:4 * L])
        c1 = f_g * c_prev + i_g * g_g
        h1 = o_g * jnp.tanh(c1)
        return h1, c1

    a_h1, a_c1 = lstm_step(0, h[:, 0:HP], h0[:, 0 * L:1 * L], h0[:, 1 * L:2 * L])
    c_h1, c_c1 = lstm_step(1, h[:, HP:2 * HP], h0[:, 2 * L:3 * L], h0[:, 3 * L:4 * L])

    # Fused heads: one lane-dense (B, HEAD_PAD) tile holding [mean | sig_pre | value].
    pre = (
        jnp.dot(a_h1, head_w_ref[0:L, :], preferred_element_type=jnp.float32)
        + jnp.dot(c_h1, head_w_ref[L:2 * L, :], preferred_element_type=jnp.float32)
        + head_b_ref[...]
    )
    col = jax.lax.broadcasted_iota(jnp.int32, pre.shape, 1)
    is_std = jnp.logical_and(col >= num_outputs, col < 2 * num_outputs)
    head_out_ref[...] = jnp.where(is_std, jax.nn.softplus(pre), pre)

    # Packed new hidden state (lane-aligned 128-wide slice stores, no masking).
    h1_ref[:, 0 * L:1 * L] = a_h1
    h1_ref[:, 1 * L:2 * L] = a_c1
    h1_ref[:, 2 * L:3 * L] = c_h1
    h1_ref[:, 3 * L:4 * L] = c_c1


def init_params(key, num_inputs, num_outputs):
    """Deterministic PyTorch-style init (uniform +/- 1/sqrt(fan_in)), raw layout."""
    def uniform(k, shape, bound):
        return jax.random.uniform(k, shape, jnp.float32, -bound, bound)

    keys = jax.random.split(key, 24)
    kh = 1.0 / math.sqrt(num_inputs)
    kl = 1.0 / math.sqrt(LSTM_SIZE)

    p = {}
    p["a_fc1_w"] = uniform(keys[0], (HIDDEN_SIZE, num_inputs), kh)
    p["a_fc1_b"] = uniform(keys[1], (HIDDEN_SIZE,), kh)
    p["a_wih"] = uniform(keys[2], (4 * LSTM_SIZE, HIDDEN_SIZE), kl)
    p["a_whh"] = uniform(keys[3], (4 * LSTM_SIZE, LSTM_SIZE), kl)
    p["a_bih"] = uniform(keys[4], (4 * LSTM_SIZE,), kl)
    p["a_bhh"] = uniform(keys[5], (4 * LSTM_SIZE,), kl)
    p["a_mu_w"] = uniform(keys[6], (num_outputs, LSTM_SIZE), kl)
    p["a_mu_b"] = uniform(keys[7], (num_outputs,), kl)
    p["a_sig_w"] = uniform(keys[8], (num_outputs, LSTM_SIZE), kl)
    p["a_sig_b"] = uniform(keys[9], (num_outputs,), kl)
    p["c_fc1_w"] = uniform(keys[10], (HIDDEN_SIZE, num_inputs), kh)
    p["c_fc1_b"] = uniform(keys[11], (HIDDEN_SIZE,), kh)
    p["c_wih"] = uniform(keys[12], (4 * LSTM_SIZE, HIDDEN_SIZE), kl)
    p["c_whh"] = uniform(keys[13], (4 * LSTM_SIZE, LSTM_SIZE), kl)
    p["c_bih"] = uniform(keys[14], (4 * LSTM_SIZE,), kl)
    p["c_bhh"] = uniform(keys[15], (4 * LSTM_SIZE,), kl)
    p["c_fc3_w"] = uniform(keys[16], (1, LSTM_SIZE), kl)
    p["c_fc3_b"] = uniform(keys[17], (1,), kl)
    return p


def pack_params(raw, num_inputs, num_outputs):
    """One-time packing of PyTorch-layout weights into kernel-ready buffers."""
    assert 2 * num_outputs + 1 <= HEAD_PAD
    f32 = jnp.float32
    H, HP, L = HIDDEN_SIZE, HIDDEN_PAD, LSTM_SIZE

    def pad_fc1(w, b):
        wt = jnp.zeros((num_inputs, HP), f32).at[:, :H].set(w.T.astype(f32))
        bt = jnp.zeros((HP,), f32).at[:H].set(b.astype(f32))
        return wt, bt

    a_w, a_b = pad_fc1(raw["a_fc1_w"], raw["a_fc1_b"])
    c_w, c_b = pad_fc1(raw["c_fc1_w"], raw["c_fc1_b"])
    fc1_w = jnp.concatenate([a_w, c_w], axis=1)                     # (ni, 2*HP)
    fc1_b = jnp.concatenate([a_b, c_b]).reshape(1, 2 * HP)

    def pad_wih(w):
        return jnp.zeros((HP, 4 * L), f32).at[:H, :].set(w.T.astype(f32))

    wih = jnp.stack([pad_wih(raw["a_wih"]), pad_wih(raw["c_wih"])])  # (2, HP, 4L)
    whh = jnp.stack([raw["a_whh"].T.astype(f32),
                     raw["c_whh"].T.astype(f32)])                    # (2, L, 4L)
    gate_b = jnp.concatenate(
        [raw["a_bih"] + raw["a_bhh"], raw["c_bih"] + raw["c_bhh"]]
    ).astype(f32).reshape(1, 2 * 4 * L)

    head_w = jnp.zeros((2 * L, HEAD_PAD), f32)
    head_w = head_w.at[:L, 0:num_outputs].set(raw["a_mu_w"].T.astype(f32))
    head_w = head_w.at[:L, num_outputs:2 * num_outputs].set(raw["a_sig_w"].T.astype(f32))
    head_w = head_w.at[L:2 * L, 2 * num_outputs:2 * num_outputs + 1].set(
        raw["c_fc3_w"].T.astype(f32))
    head_b = jnp.zeros((HEAD_PAD,), f32)
    head_b = head_b.at[0:num_outputs].set(raw["a_mu_b"].astype(f32))
    head_b = head_b.at[num_outputs:2 * num_outputs].set(raw["a_sig_b"].astype(f32))
    head_b = head_b.at[2 * num_outputs:2 * num_outputs + 1].set(raw["c_fc3_b"].astype(f32))
    head_b = head_b.reshape(1, HEAD_PAD)

    return dict(fc1_w=fc1_w, fc1_b=fc1_b, wih=wih, whh=whh,
                gate_b=gate_b, head_w=head_w, head_b=head_b)


@functools.partial(jax.jit, static_argnames=("num_outputs",))
def actor_critic_forward(states, actor_hidden, critic_hidden, packed, *, num_outputs):
    """Pallas forward. actor_hidden / critic_hidden are (h, c) with shape (1, B, lstm)."""
    f32 = jnp.float32
    L = LSTM_SIZE
    B = states.shape[0]

    a_h0, a_c0 = actor_hidden
    c_h0, c_c0 = critic_hidden
    h0 = jnp.concatenate(
        [a_h0.reshape(B, L), a_c0.reshape(B, L),
         c_h0.reshape(B, L), c_c0.reshape(B, L)], axis=1).astype(f32)   # (B, 4L)

    kernel = functools.partial(actor_critic_kernel, num_outputs=num_outputs)
    vmem = pl.BlockSpec(memory_space=pltpu.MemorySpace.VMEM)

    head_out, h1 = pl.pallas_call(
        kernel,
        out_shape=(
            jax.ShapeDtypeStruct((B, HEAD_PAD), f32),   # [mean | std | value | 0]
            jax.ShapeDtypeStruct((B, 4 * L), f32),      # [a_h1 | a_c1 | c_h1 | c_c1]
        ),
        in_specs=[vmem] * 9,
        out_specs=(vmem, vmem),
        input_output_aliases={1: 1},  # packed hidden state: in-place update
    )(
        states.astype(f32), h0,
        packed["fc1_w"], packed["fc1_b"],
        packed["wih"], packed["whh"], packed["gate_b"],
        packed["head_w"], packed["head_b"],
    )

    mean = head_out[:, 0:num_outputs]
    std = head_out[:, num_outputs:2 * num_outputs]
    value = head_out[:, 2 * num_outputs:2 * num_outputs + 1]
    actor_newh = (h1[:, 0 * L:1 * L].reshape(1, B, L),
                  h1[:, 1 * L:2 * L].reshape(1, B, L))
    critic_newh = (h1[:, 2 * L:3 * L].reshape(1, B, L),
                   h1[:, 3 * L:4 * L].reshape(1, B, L))
    return mean, std, actor_newh, value, critic_newh


def reference_forward(states, actor_hidden, critic_hidden, params):
    """Pure-JAX reference mirroring the PyTorch module exactly (raw params)."""
    def branch(x, fc1_w, fc1_b, wih, whh, bih, bhh, h0, c0):
        h = jnp.maximum(x @ fc1_w.T + fc1_b, 0.0)
        gates = h @ wih.T + bih + h0 @ whh.T + bhh
        H = LSTM_SIZE
        i = jax.nn.sigmoid(gates[:, 0 * H:1 * H])
        f = jax.nn.sigmoid(gates[:, 1 * H:2 * H])
        g = jnp.tanh(gates[:, 2 * H:3 * H])
        o = jax.nn.sigmoid(gates[:, 3 * H:4 * H])
        c1 = f * c0 + i * g
        h1 = o * jnp.tanh(c1)
        return h1, c1

    B = states.shape[0]
    a_h0, a_c0 = (h.reshape(B, LSTM_SIZE) for h in actor_hidden)
    c_h0, c_c0 = (h.reshape(B, LSTM_SIZE) for h in critic_hidden)
    a_h1, a_c1 = branch(states, params["a_fc1_w"], params["a_fc1_b"],
                        params["a_wih"], params["a_whh"], params["a_bih"],
                        params["a_bhh"], a_h0, a_c0)
    mean = a_h1 @ params["a_mu_w"].T + params["a_mu_b"]
    std = jax.nn.softplus(a_h1 @ params["a_sig_w"].T + params["a_sig_b"])
    c_h1, c_c1 = branch(states, params["c_fc1_w"], params["c_fc1_b"],
                        params["c_wih"], params["c_whh"], params["c_bih"],
                        params["c_bhh"], c_h0, c_c0)
    value = c_h1 @ params["c_fc3_w"].T + params["c_fc3_b"]
    return mean, std, (a_h1, a_c1), value, (c_h1, c_c1)


if __name__ == "__main__":
    key = jax.random.PRNGKey(0)
    B = 8            # batch of states (>= 8 => full f32 sublane tile)
    num_inputs = 11  # Hopper-v2 observation dim
    num_outputs = 3  # Hopper-v2 action dim

    k_param, k_s, k_ah, k_ac, k_ch, k_cc = jax.random.split(key, 6)
    raw_params = init_params(k_param, num_inputs, num_outputs)
    packed_params = pack_params(raw_params, num_inputs, num_outputs)   # once, at init

    states = jax.random.normal(k_s, (B, num_inputs), jnp.float32)
    actor_hidden = (
        jax.random.normal(k_ah, (1, B, LSTM_SIZE), jnp.float32),
        jax.random.normal(k_ac, (1, B, LSTM_SIZE), jnp.float32),
    )
    critic_hidden = (
        jax.random.normal(k_ch, (1, B, LSTM_SIZE), jnp.float32),
        jax.random.normal(k_cc, (1, B, LSTM_SIZE), jnp.float32),
    )

    mean, std, actor_newh, value, critic_newh = actor_critic_forward(
        states, actor_hidden, critic_hidden, packed_params, num_outputs=num_outputs)
    jax.block_until_ready((mean, std, actor_newh, value, critic_newh))

    # correctness check against a pure-JAX reference (raw PyTorch-layout params)
    r_mean, r_std, (r_ah, r_ac), r_val, (r_ch, r_cc) = reference_forward(
        states, actor_hidden, critic_hidden, raw_params)

    assert mean.shape == (B, num_outputs) and std.shape == (B, num_outputs)
    assert value.shape == (B, 1)
    assert actor_newh[0].shape == (1, B, LSTM_SIZE)
    np.testing.assert_allclose(np.asarray(mean), np.asarray(r_mean), atol=1e-5, rtol=1e-5)
    np.testing.assert_allclose(np.asarray(std), np.asarray(r_std), atol=1e-5, rtol=1e-5)
    np.testing.assert_allclose(np.asarray(value), np.asarray(r_val), atol=1e-5, rtol=1e-5)
    np.testing.assert_allclose(np.asarray(actor_newh[0][0]), np.asarray(r_ah), atol=1e-5, rtol=1e-5)
    np.testing.assert_allclose(np.asarray(actor_newh[1][0]), np.asarray(r_ac), atol=1e-5, rtol=1e-5)
    np.testing.assert_allclose(np.asarray(critic_newh[0][0]), np.asarray(r_ch), atol=1e-5, rtol=1e-5)
    np.testing.assert_allclose(np.asarray(critic_newh[1][0]), np.asarray(r_cc), atol=1e-5, rtol=1e-5)

    print("KERNEL_OK")
</pallas_src>

<mosaic_0001>
module attributes {stable_mosaic.version = 11 : i64} {
  func.func @actor_critic_kernel(%arg0: memref<8x11xf32, #tpu.memory_space<vmem>>, %arg1: memref<8x512xf32, #tpu.memory_space<vmem>>, %arg2: memref<11x512xf32, #tpu.memory_space<vmem>>, %arg3: memref<1x512xf32, #tpu.memory_space<vmem>>, %arg4: memref<2x256x512xf32, #tpu.memory_space<vmem>>, %arg5: memref<2x128x512xf32, #tpu.memory_space<vmem>>, %arg6: memref<1x1024xf32, #tpu.memory_space<vmem>>, %arg7: memref<256x128xf32, #tpu.memory_space<vmem>>, %arg8: memref<1x128xf32, #tpu.memory_space<vmem>>, %arg9: memref<8x128xf32, #tpu.memory_space<vmem>>, %arg10: memref<8x512xf32, #tpu.memory_space<vmem>>) attributes {dimension_semantics = [], scalar_prefetch = 0 : i64, scratch_operands = 0 : i64, tpu.core_type = #tpu.core_type<tc>} {
    %c0 = arith.constant 0 : index
    %c0_0 = arith.constant 0 : index
    %0 = vector.load %arg0[%c0, %c0_0] : memref<8x11xf32, #tpu.memory_space<vmem>>, vector<8x11xf32>
    %c0_1 = arith.constant 0 : index
    %c0_2 = arith.constant 0 : index
    %1 = vector.load %arg1[%c0_1, %c0_2] : memref<8x512xf32, #tpu.memory_space<vmem>>, vector<8x512xf32>
    %c0_3 = arith.constant 0 : index
    %c0_4 = arith.constant 0 : index
    %2 = vector.load %arg2[%c0_3, %c0_4] : memref<11x512xf32, #tpu.memory_space<vmem>>, vector<11x512xf32>
    %cst = arith.constant dense<0.000000e+00> : vector<8x512xf32>
    %3 = tpu.matmul %0, %2, %cst {dimension_numbers = #tpu.dot_dimension_numbers<[1], [0], [0], [1], [0, 0, 1, 1], [], []>} : vector<8x11xf32>, vector<11x512xf32>, vector<8x512xf32> -> vector<8x512xf32>
    %c0_5 = arith.constant 0 : index
    %c0_6 = arith.constant 0 : index
    %4 = vector.load %arg3[%c0_5, %c0_6] : memref<1x512xf32, #tpu.memory_space<vmem>>, vector<1x512xf32>
    %5 = vector.broadcast %4 : vector<1x512xf32> to vector<8x512xf32>
    %6 = arith.addf %3, %5 : vector<8x512xf32>
    %cst_7 = arith.constant 0.000000e+00 : f32
    %7 = vector.broadcast %cst_7 : f32 to vector<8x512xf32>
    %8 = arith.maximumf %6, %7 : vector<8x512xf32>
    %9 = vector.extract_strided_slice %8 {offsets = [0, 0], sizes = [8, 256], strides = [1, 1]} : vector<8x512xf32> to vector<8x256xf32>
    %10 = vector.extract_strided_slice %1 {offsets = [0, 0], sizes = [8, 128], strides = [1, 1]} : vector<8x512xf32> to vector<8x128xf32>
    %11 = vector.extract_strided_slice %1 {offsets = [0, 128], sizes = [8, 128], strides = [1, 1]} : vector<8x512xf32> to vector<8x128xf32>
    %c0_8 = arith.constant 0 : index
    %c0_9 = arith.constant 0 : index
    %c0_10 = arith.constant 0 : index
    %12 = vector.load %arg4[%c0_8, %c0_9, %c0_10] : memref<2x256x512xf32, #tpu.memory_space<vmem>>, vector<1x256x512xf32>
    %13 = vector.shape_cast %12 : vector<1x256x512xf32> to vector<256x512xf32>
    %cst_11 = arith.constant dense<0.000000e+00> : vector<8x512xf32>
    %14 = tpu.matmul %9, %13, %cst_11 {dimension_numbers = #tpu.dot_dimension_numbers<[1], [0], [0], [1], [0, 0, 1, 1], [], []>} : vector<8x256xf32>, vector<256x512xf32>, vector<8x512xf32> -> vector<8x512xf32>
    %c0_12 = arith.constant 0 : index
    %c0_13 = arith.constant 0 : index
    %c0_14 = arith.constant 0 : index
    %15 = vector.load %arg5[%c0_12, %c0_13, %c0_14] : memref<2x128x512xf32, #tpu.memory_space<vmem>>, vector<1x128x512xf32>
    %16 = vector.shape_cast %15 : vector<1x128x512xf32> to vector<128x512xf32>
    %cst_15 = arith.constant dense<0.000000e+00> : vector<8x512xf32>
    %17 = tpu.matmul %10, %16, %cst_15 {dimension_numbers = #tpu.dot_dimension_numbers<[1], [0], [0], [1], [0, 0, 1, 1], [], []>} : vector<8x128xf32>, vector<128x512xf32>, vector<8x512xf32> -> vector<8x512xf32>
    %18 = arith.addf %14, %17 : vector<8x512xf32>
    %c0_16 = arith.constant 0 : index
    %c0_17 = arith.constant 0 : index
    %19 = vector.load %arg6[%c0_16, %c0_17] : memref<1x1024xf32, #tpu.memory_space<vmem>>, vector<1x512xf32>
    %20 = vector.broadcast %19 : vector<1x512xf32> to vector<8x512xf32>
    %21 = arith.addf %18, %20 : vector<8x512xf32>
    %22 = vector.extract_strided_slice %21 {offsets = [0, 0], sizes = [8, 128], strides = [1, 1]} : vector<8x512xf32> to vector<8x128xf32>
    %23 = arith.negf %22 : vector<8x128xf32>
    %24 = math.exp %23 : vector<8x128xf32>
    %cst_18 = arith.constant 1.000000e+00 : f32
    %25 = vector.broadcast %cst_18 : f32 to vector<8x128xf32>
    %26 = arith.addf %25, %24 : vector<8x128xf32>
    %27 = arith.divf %25, %26 : vector<8x128xf32>
    %28 = vector.extract_strided_slice %21 {offsets = [0, 128], sizes = [8, 128], strides = [1, 1]} : vector<8x512xf32> to vector<8x128xf32>
    %29 = arith.negf %28 : vector<8x128xf32>
    %30 = math.exp %29 : vector<8x128xf32>
    %cst_19 = arith.constant 1.000000e+00 : f32
    %31 = vector.broadcast %cst_19 : f32 to vector<8x128xf32>
    %32 = arith.addf %31, %30 : vector<8x128xf32>
    %33 = arith.divf %31, %32 : vector<8x128xf32>
    %34 = vector.extract_strided_slice %21 {offsets = [0, 256], sizes = [8, 128], strides = [1, 1]} : vector<8x512xf32> to vector<8x128xf32>
    %35 = math.tanh %34 : vector<8x128xf32>
    %36 = vector.extract_strided_slice %21 {offsets = [0, 384], sizes = [8, 128], strides = [1, 1]} : vector<8x512xf32> to vector<8x128xf32>
    %37 = arith.negf %36 : vector<8x128xf32>
    %38 = math.exp %37 : vector<8x128xf32>
    %cst_20 = arith.constant 1.000000e+00 : f32
    %39 = vector.broadcast %cst_20 : f32 to vector<8x128xf32>
    %40 = arith.addf %39, %38 : vector<8x128xf32>
    %41 = arith.divf %39, %40 : vector<8x128xf32>
    %42 = arith.mulf %33, %11 : vector<8x128xf32>
    %43 = arith.mulf %27, %35 : vector<8x128xf32>
    %44 = arith.addf %42, %43 : vector<8x128xf32>
    %45 = math.tanh %44 : vector<8x128xf32>
    %46 = arith.mulf %41, %45 : vector<8x128xf32>
    %47 = vector.extract_strided_slice %8 {offsets = [0, 256], sizes = [8, 256], strides = [1, 1]} : vector<8x512xf32> to vector<8x256xf32>
    %48 = vector.extract_strided_slice %1 {offsets = [0, 256], sizes = [8, 128], strides = [1, 1]} : vector<8x512xf32> to vector<8x128xf32>
    %49 = vector.extract_strided_slice %1 {offsets = [0, 384], sizes = [8, 128], strides = [1, 1]} : vector<8x512xf32> to vector<8x128xf32>
    %c1 = arith.constant 1 : index
    %c0_21 = arith.constant 0 : index
    %c0_22 = arith.constant 0 : index
    %50 = vector.load %arg4[%c1, %c0_21, %c0_22] : memref<2x256x512xf32, #tpu.memory_space<vmem>>, vector<1x256x512xf32>
    %51 = vector.shape_cast %50 : vector<1x256x512xf32> to vector<256x512xf32>
    %cst_23 = arith.constant dense<0.000000e+00> : vector<8x512xf32>
    %52 = tpu.matmul %47, %51, %cst_23 {dimension_numbers = #tpu.dot_dimension_numbers<[1], [0], [0], [1], [0, 0, 1, 1], [], []>} : vector<8x256xf32>, vector<256x512xf32>, vector<8x512xf32> -> vector<8x512xf32>
    %c1_24 = arith.constant 1 : index
    %c0_25 = arith.constant 0 : index
    %c0_26 = arith.constant 0 : index
    %53 = vector.load %arg5[%c1_24, %c0_25, %c0_26] : memref<2x128x512xf32, #tpu.memory_space<vmem>>, vector<1x128x512xf32>
    %54 = vector.shape_cast %53 : vector<1x128x512xf32> to vector<128x512xf32>
    %cst_27 = arith.constant dense<0.000000e+00> : vector<8x512xf32>
    %55 = tpu.matmul %48, %54, %cst_27 {dimension_numbers = #tpu.dot_dimension_numbers<[1], [0], [0], [1], [0, 0, 1, 1], [], []>} : vector<8x128xf32>, vector<128x512xf32>, vector<8x512xf32> -> vector<8x512xf32>
    %56 = arith.addf %52, %55 : vector<8x512xf32>
    %c0_28 = arith.constant 0 : index
    %c512 = arith.constant 512 : index
    %57 = vector.load %arg6[%c0_28, %c512] : memref<1x1024xf32, #tpu.memory_space<vmem>>, vector<1x512xf32>
    %58 = vector.broadcast %57 : vector<1x512xf32> to vector<8x512xf32>
    %59 = arith.addf %56, %58 : vector<8x512xf32>
    %60 = vector.extract_strided_slice %59 {offsets = [0, 0], sizes = [8, 128], strides = [1, 1]} : vector<8x512xf32> to vector<8x128xf32>
    %61 = arith.negf %60 : vector<8x128xf32>
    %62 = math.exp %61 : vector<8x128xf32>
    %cst_29 = arith.constant 1.000000e+00 : f32
    %63 = vector.broadcast %cst_29 : f32 to vector<8x128xf32>
    %64 = arith.addf %63, %62 : vector<8x128xf32>
    %65 = arith.divf %63, %64 : vector<8x128xf32>
    %66 = vector.extract_strided_slice %59 {offsets = [0, 128], sizes = [8, 128], strides = [1, 1]} : vector<8x512xf32> to vector<8x128xf32>
    %67 = arith.negf %66 : vector<8x128xf32>
    %68 = math.exp %67 : vector<8x128xf32>
    %cst_30 = arith.constant 1.000000e+00 : f32
    %69 = vector.broadcast %cst_30 : f32 to vector<8x128xf32>
    %70 = arith.addf %69, %68 : vector<8x128xf32>
    %71 = arith.divf %69, %70 : vector<8x128xf32>
    %72 = vector.extract_strided_slice %59 {offsets = [0, 256], sizes = [8, 128], strides = [1, 1]} : vector<8x512xf32> to vector<8x128xf32>
    %73 = math.tanh %72 : vector<8x128xf32>
    %74 = vector.extract_strided_slice %59 {offsets = [0, 384], sizes = [8, 128], strides = [1, 1]} : vector<8x512xf32> to vector<8x128xf32>
    %75 = arith.negf %74 : vector<8x128xf32>
    %76 = math.exp %75 : vector<8x128xf32>
    %cst_31 = arith.constant 1.000000e+00 : f32
    %77 = vector.broadcast %cst_31 : f32 to vector<8x128xf32>
    %78 = arith.addf %77, %76 : vector<8x128xf32>
    %79 = arith.divf %77, %78 : vector<8x128xf32>
    %80 = arith.mulf %71, %49 : vector<8x128xf32>
    %81 = arith.mulf %65, %73 : vector<8x128xf32>
    %82 = arith.addf %80, %81 : vector<8x128xf32>
    %83 = math.tanh %82 : vector<8x128xf32>
    %84 = arith.mulf %79, %83 : vector<8x128xf32>
    %c0_32 = arith.constant 0 : index
    %c0_33 = arith.constant 0 : index
    %85 = vector.load %arg7[%c0_32, %c0_33] : memref<256x128xf32, #tpu.memory_space<vmem>>, vector<128x128xf32>
    %cst_34 = arith.constant dense<0.000000e+00> : vector<8x128xf32>
    %86 = tpu.matmul %46, %85, %cst_34 {dimension_numbers = #tpu.dot_dimension_numbers<[1], [0], [0], [1], [0, 0, 1, 1], [], []>} : vector<8x128xf32>, vector<128x128xf32>, vector<8x128xf32> -> vector<8x128xf32>
    %c128 = arith.constant 128 : index
    %c0_35 = arith.constant 0 : index
    %87 = vector.load %arg7[%c128, %c0_35] : memref<256x128xf32, #tpu.memory_space<vmem>>, vector<128x128xf32>
    %cst_36 = arith.constant dense<0.000000e+00> : vector<8x128xf32>
    %88 = tpu.matmul %84, %87, %cst_36 {dimension_numbers = #tpu.dot_dimension_numbers<[1], [0], [0], [1], [0, 0, 1, 1], [], []>} : vector<8x128xf32>, vector<128x128xf32>, vector<8x128xf32> -> vector<8x128xf32>
    %89 = arith.addf %86, %88 : vector<8x128xf32>
    %c0_37 = arith.constant 0 : index
    %c0_38 = arith.constant 0 : index
    %90 = vector.load %arg8[%c0_37, %c0_38] : memref<1x128xf32, #tpu.memory_space<vmem>>, vector<1x128xf32>
    %91 = vector.broadcast %90 : vector<1x128xf32> to vector<8x128xf32>
    %92 = arith.addf %89, %91 : vector<8x128xf32>
    %93 = tpu.iota {dimensions = array<i32: 1>} : vector<8x128xi32>
    %c3_i32 = arith.constant 3 : i32
    %94 = vector.broadcast %c3_i32 : i32 to vector<8x128xi32>
    %95 = arith.cmpi sge, %93, %94 : vector<8x128xi32>
    %c6_i32 = arith.constant 6 : i32
    %96 = vector.broadcast %c6_i32 : i32 to vector<8x128xi32>
    %97 = arith.cmpi slt, %93, %96 : vector<8x128xi32>
    %98 = arith.andi %95, %97 : vector<8x128xi1>
    %cst_39 = arith.constant 0.000000e+00 : f32
    %99 = vector.broadcast %cst_39 : f32 to vector<8x128xf32>
    %100 = arith.maximumf %92, %99 : vector<8x128xf32>
    %101 = vector.broadcast %cst_39 : f32 to vector<8x128xf32>
    %102 = arith.subf %92, %101 : vector<8x128xf32>
    %103 = arith.cmpf one, %102, %102 : vector<8x128xf32>
    %104 = vector.broadcast %cst_39 : f32 to vector<8x128xf32>
    %105 = arith.addf %92, %104 : vector<8x128xf32>
    %106 = math.absf %102 : vector<8x128xf32>
    %cst_40 = arith.constant 0.000000e+00 : f32
    %107 = vector.broadcast %cst_40 : f32 to vector<8x128xf32>
    %108 = arith.subf %107, %106 : vector<8x128xf32>
    %109 = math.exp %108 : vector<8x128xf32>
    %110 = math.log1p %109 : vector<8x128xf32>
    %111 = arith.addf %100, %110 : vector<8x128xf32>
    %112 = arith.select %103, %105, %111 : vector<8x128xi1>, vector<8x128xf32>
    %113 = arith.select %98, %112, %92 : vector<8x128xi1>, vector<8x128xf32>
    %c0_41 = arith.constant 0 : index
    %c0_42 = arith.constant 0 : index
    %114 = vector.load %arg9[%c0_41, %c0_42] : memref<8x128xf32, #tpu.memory_space<vmem>>, vector<8x128xf32>
    tpu.vector_store %arg9[%c0_41, %c0_42], %113 {strides = array<i32>} : memref<8x128xf32, #tpu.memory_space<vmem>>, vector<8x128xf32>,
    %c0_43 = arith.constant 0 : index
    %c0_44 = arith.constant 0 : index
    %115 = vector.load %arg10[%c0_43, %c0_44] : memref<8x512xf32, #tpu.memory_space<vmem>>, vector<8x128xf32>
    tpu.vector_store %arg10[%c0_43, %c0_44], %46 {strides = array<i32>} : memref<8x512xf32, #tpu.memory_space<vmem>>, vector<8x128xf32>,
    %c0_45 = arith.constant 0 : index
    %c128_46 = arith.constant 128 : index
    %116 = vector.load %arg10[%c0_45, %c128_46] : memref<8x512xf32, #tpu.memory_space<vmem>>, vector<8x128xf32>
    tpu.vector_store %arg10[%c0_45, %c128_46], %44 {strides = array<i32>} : memref<8x512xf32, #tpu.memory_space<vmem>>, vector<8x128xf32>,
    %c0_47 = arith.constant 0 : index
    %c256 = arith.constant 256 : index
    %117 = vector.load %arg10[%c0_47, %c256] : memref<8x512xf32, #tpu.memory_space<vmem>>, vector<8x128xf32>
    tpu.vector_store %arg10[%c0_47, %c256], %84 {strides = array<i32>} : memref<8x512xf32, #tpu.memory_space<vmem>>, vector<8x128xf32>,
    %c0_48 = arith.constant 0 : index
    %c384 = arith.constant 384 : index
    %118 = vector.load %arg10[%c0_48, %c384] : memref<8x512xf32, #tpu.memory_space<vmem>>, vector<8x128xf32>
    tpu.vector_store %arg10[%c0_48, %c384], %82 {strides = array<i32>} : memref<8x512xf32, #tpu.memory_space<vmem>>, vector<8x128xf32>,
    return
  }
}

</mosaic_0001>

<bundles_post_ra>
// kernel: actor_critic_forward.1
= control target key start
LH: loop header
LB: loop body
LE: loop exit
PB: predicated region body
PF: predicated region fallthrough
CT: control target
= control target key end

     0   :  { %16 = vsyncpa [#allocation3], 0  ;;  %s2485_s0 = inlined_call_operand.vmem [shape: f32[8,11], index: 0, kind: input, shape index: {}]   ;;  %s2486_s1 = inlined_call_operand.vmem [shape: f32[8,512], index: 1, kind: input, shape index: {}, may-alias: {1,10}]   ;;  %s2487_s2 = inlined_call_operand.vmem [shape: f32[11,512], index: 2, kind: input, shape index: {}]   ;;  %s2488_s3 = inlined_call_operand.vmem [shape: f32[1,512], index: 3, kind: input, shape index: {}]   ;;  %s2489_s4 = inlined_call_operand.hbm [shape: f32[2,256,512], index: 4, kind: input, shape index: {}]   ;;  %s2490_s5 = inlined_call_operand.hbm [shape: f32[2,128,512], index: 5, kind: input, shape index: {}]   ;;  %s2491_s6 = inlined_call_operand.vmem [shape: f32[1,1024], index: 6, kind: input, shape index: {}]   ;;  %s2492_s7 = inlined_call_operand.hbm [shape: f32[256,128], index: 7, kind: input, shape index: {}]   ;;  %s2493_s8 = inlined_call_operand.vmem [shape: f32[1,128], index: 8, kind: input, shape index: {}]   ;;  %s2494_s9 = inlined_call_operand.vmem [shape: f32[8,128], index: 9, kind: output, shape index: {0}]   ;;  %s2495_s10 = inlined_call_operand.vmem [shape: f32[8,512], index: 10, kind: output, shape index: {1}, may-alias: {1,10}]  }
   0x1   :  { %17 = vsyncpa [#allocation5], 0  ;;  %s2232_s13 = smov [#allocation4]   ;;  %s2233_s15 = smov [#allocation2]  }
   0x2   :  { %s43_s14 = sshll.u32 %s2232_s13, 4  ;;  %s31_s16 = sshll.u32 %s2233_s15, 4  ;;  %s44_s14 = int_to_ptr.vmem [resolvable:$true] %s43_s14  ;;  %s2298_s16 = int_to_ptr.vmem [resolvable:$true] %s31_s16 }
   0x3   :  { %s2162_s19 = scalar_lea.hbm %s2490_s5, 16384 }
   0x4   :  { %p2163_p0 = scmp.ne.s32.totalorder %s2490_s5, %s2162_s19  ;;  %p2166_p1 = scmp.lt.u32.totalorder %s2162_s19, %s2490_s5 }
   0x6   :  { %p2168_p2 = pnand %p2166_p1, %p2163_p0 }
   0x8   :  { %2171 = shalt.err (!%p2168_p2)
}
   0x9   :  { %s2172_s24 = scalar_lea.vmem %s44_s14, 16384  ;;  %p2177_p4 = scmp.lt.s32.totalorder %s44_s14, %s44_s14 }
   0xa   :  { %p2173_p3 = scmp.ne.s32.totalorder %s44_s14, %s2172_s24  ;;  %p2178_p5 = scmp.lt.s32.totalorder %s2172_s24, %s2172_s24 }
   0xc   :  { %p2179_p6 = por %p2178_p5, %p2177_p4 }
   0xe   :  { %p2180_p7 = pnand %p2179_p6, %p2173_p3 }
  0x10   :  { %2183 = shalt.err (!%p2180_p7)
}
  0x11   :  { %s2234_s25 = smov 512   ;;  %s2235_s26 = smov 32  }
  0x12   :  { %49 = dma.hbm_to_vmem [thread:$0]  %s2490_s5, 16384, %s44_s14, [#allocation5], %s2234_s25, %s2234_s25, %s2235_s26  }
  0x13   :  { %s2184_s11 = scalar_lea.hbm %s2489_s4, 32768 }
  0x14   :  { %p2185_p8 = scmp.ne.s32.totalorder %s2489_s4, %s2184_s11  ;;  %p2188_p9 = scmp.lt.u32.totalorder %s2184_s11, %s2489_s4 }
  0x16   :  { %p2190_p10 = pnand %p2188_p9, %p2185_p8 }
  0x18   :  { %2193 = shalt.err (!%p2190_p10)
}
  0x19   :  { %s2194_s18 = scalar_lea.vmem %s2298_s16, 32768  ;;  %p2199_p12 = scmp.lt.s32.totalorder %s2298_s16, %s2298_s16 }
  0x1a   :  { %p2195_p11 = scmp.ne.s32.totalorder %s2298_s16, %s2194_s18  ;;  %p2200_p13 = scmp.lt.s32.totalorder %s2194_s18, %s2194_s18 }
  0x1c   :  { %p2201_p0 = por %p2200_p13, %p2199_p12 }
  0x1e   :  { %p2202_p1 = pnand %p2201_p0, %p2195_p11 }
  0x20   :  { %2205 = shalt.err (!%p2202_p1)
}
  0x21   :  { %37 = dma.hbm_to_vmem [thread:$0]  %s2489_s4, 32768, %s2298_s16, [#allocation3], %s2234_s25, %s2234_s25, %s2235_s26  }
  0x22   :  { %s2236_s19 = smov [#allocation6]   ;;  %s2206_s23 = scalar_lea.hbm %s2492_s7, 4096 }
  0x23   :  { %s57_s20 = sshll.u32 %s2236_s19, 4  ;;  %p2207_p2 = scmp.ne.s32.totalorder %s2492_s7, %s2206_s23  ;;  %s58_s20 = int_to_ptr.vmem [resolvable:$true] %s57_s20 }
  0x24   :  { %p2210_p3 = scmp.lt.u32.totalorder %s2206_s23, %s2492_s7 }
  0x26   :  { %p2212_p4 = pnand %p2210_p3, %p2207_p2 }
  0x28   :  { %2215 = shalt.err (!%p2212_p4)
}
  0x29   :  { %s2216_s30 = scalar_lea.vmem %s58_s20, 4096  ;;  %p2221_p6 = scmp.lt.s32.totalorder %s58_s20, %s58_s20 }
  0x2a   :  { %p2217_p5 = scmp.ne.s32.totalorder %s58_s20, %s2216_s30  ;;  %p2222_p7 = scmp.lt.s32.totalorder %s2216_s30, %s2216_s30 }
  0x2c   :  { %p2223_p8 = por %p2222_p7, %p2221_p6 }
  0x2e   :  { %p2224_p9 = pnand %p2223_p8, %p2217_p5 }
  0x30   :  { %2227 = shalt.err (!%p2224_p9)
}
  0x31   :  { %s2237_s4 = smov 128   ;;  %s2238_s16 = smov 8  }
  0x32   :  { %63 = dma.hbm_to_vmem [thread:$0]  %s2492_s7, 4096, %s58_s20, [#allocation5], %s2237_s4, %s2237_s4, %s2238_s16  }
  0x33   :  { %2228 = dma.done.wait [#allocation3], 32768  }
  0x34   :  { %2229 = vsyncadd [#allocation3], 4294934528 }
  0x35   :  { %2230 = dma.done.wait [#allocation5], 20480  }
  0x36   :  { %2231 = vsyncadd [#allocation5], 4294946816  ;;  %v2239_v0 = vmov 0.0   ;;  %vm114_vm0 = vcmask 1042432   ;;  %vm2240_vm1 = vmmov 1   ;;  %v81_v2 = vld [vmem:[%s2487_s2 + $0x8] sm:$0xff] }
  0x37   :  { %191 = vmatprep.mubr.f32.mxu0 %v2239_v0  ;;  %262 = vmatprep.mubr.f32.mxu1 %v2239_v0  ;;  %vm2343_vm2 = vmpackc.low %vm114_vm0, %vm2240_vm1  ;;  %v85_v3 = vld [vmem:[%s2487_s2 + $0x28] sm:$0x7]  ;;  %v80_v4 = vld [vmem:[%s2487_s2] sm:$0xff]  ;;  %vm110_vm3 = vcmask 89088   ;;  %vm2242_vm4 = vmmov 0  }
  0x38   :  { %v1663_v5 = vpack.c.bf16 %v85_v3, %v81_v2  ;;  %v84_v6 = vld [vmem:[%s2487_s2 + $0x20] sm:$0x7]  ;;  %v83_v7 = vld [vmem:[%s2487_s2 + $0x18] sm:$0xff]  ;;  %v82_v11 = vld [vmem:[%s2487_s2 + $0x10] sm:$0xff] }
  0x39   :  { %v1666_v8 = vpack.c.bf16 %v84_v6, %v80_v4  ;;  %v75_v9 = vld [vmem:[%s2485_s0] sm:$0xff]  ;;  %v87_v10 = vld [vmem:[%s2487_s2 + $0x38] sm:$0x7]  ;;  %v86_v12 = vld [vmem:[%s2487_s2 + $0x30] sm:$0x7] }
  0x3a   :  { %1665 = vmatprep.subr.msk.bf16.mxu0 %vm2343_vm2, %v1663_v5  ;;  %v1669_v13 = vpack.c.bf16 %v87_v10, %v83_v7  ;;  %v1672_v14 = vpack.c.bf16 %v86_v12, %v82_v11  ;;  %v402_v15 = vld [vmem:[#allocation4 + $0x8] sm:$0xff]  ;;  %v404_v17 = vld [vmem:[#allocation4 + $0x18] sm:$0xff]  ;;  %v401_v20 = vld [vmem:[#allocation4] sm:$0xff] }
  0x3b   :  { %v406_v16 = vld [vmem:[#allocation4 + $0x28] sm:$0xff]  ;;  %1668 = vmatpush1.bf16.msk.msra.mxu0 %vm2343_vm2, %v1666_v8  ;;  %v408_v19 = vld [vmem:[#allocation4 + $0x38] sm:$0xff]  ;;  %v405_v21 = vld [vmem:[#allocation4 + $0x20] sm:$0xff] }
  0x3c   :  { %v1675_v18 = vpack.c.bf16 %v406_v16, %v402_v15  ;;  %1671 = vmatprep.subr.msk.bf16.mxu1 %vm2343_vm2, %v1669_v13  ;;  %v1707_v22 = vpack.c.bf16 %v408_v19, %v404_v17  ;;  %v1677_v23 = vpack.c.bf16 %v405_v21, %v401_v20  ;;  %v403_v24 = vld [vmem:[#allocation4 + $0x10] sm:$0xff]  ;;  %v410_v26 = vld [vmem:[#allocation4 + $0x48] sm:$0xff]  ;;  %v412_v29 = vld [vmem:[#allocation4 + $0x58] sm:$0xff] }
  0x3d   :  { %v407_v25 = vld [vmem:[#allocation4 + $0x30] sm:$0xff]  ;;  %1674 = vmatpush1.bf16.msk.msra.mxu1 %vm2343_vm2, %v1672_v14  ;;  %v414_v28 = vld [vmem:[#allocation4 + $0x68] sm:$0xff]  ;;  %v416_v30 = vld [vmem:[#allocation4 + $0x78] sm:$0xff] }
  0x3e   :  { %1676 = vmatprep.subr.bf16.mxu0 %v1675_v18  ;;  %v1709_v27 = vpack.c.bf16 %v407_v25, %v403_v24  ;;  %1548 = vmatmul.mubr.msk.f32.vlgmr.msra.gmra.mrb[0].mxu0 %vm110_vm3, %v75_v9  ;;  %v1679_v31 = vpack.c.bf16 %v414_v28, %v410_v26  ;;  %v1711_v32 = vpack.c.bf16 %v416_v30, %v412_v29  ;;  %v409_v33 = vld [vmem:[#allocation4 + $0x40] sm:$0xff]  ;;  %v411_v35 = vld [vmem:[#allocation4 + $0x50] sm:$0xff]  ;;  %v418_v38 = vld [vmem:[#allocation4 + $0x88] sm:$0xff] }
  0x3f   :  { %1708 = vmatprep.subr.bf16.mxu1 %v1707_v22  ;;  %v413_v34 = vld [vmem:[#allocation4 + $0x60] sm:$0xff]  ;;  %1678 = vmatpush1.bf16.msra.mxu0 %v1677_v23  ;;  %v415_v37 = vld [vmem:[#allocation4 + $0x70] sm:$0xff]  ;;  %v422_v39 = vld [vmem:[#allocation4 + $0xa8] sm:$0xff] }
  0x40   :  { %v1681_v36 = vpack.c.bf16 %v413_v34, %v409_v33  ;;  %529 = vmatprep.mubr.f32.mxu0 %v2239_v0  ;;  %1551 = vmatmul.mubr.msk.f32.vlgmr.msra.gmra.mrb[0].mxu1 %vm110_vm3, %v75_v9  ;;  %v1683_v40 = vpack.c.bf16 %v422_v39, %v418_v38  ;;  %v420_v41 = vld [vmem:[#allocation4 + $0x98] sm:$0xff]  ;;  %v417_v43 = vld [vmem:[#allocation4 + $0x80] sm:$0xff]  ;;  %v1713_v44 = vpack.c.bf16 %v415_v37, %v411_v35  ;;  %v419_v46 = vld [vmem:[#allocation4 + $0x90] sm:$0xff] }
  0x41   :  { %1680 = vmatprep.subr.bf16.mxu0 %v1679_v31  ;;  %v424_v42 = vld [vmem:[#allocation4 + $0xb8] sm:$0xff]  ;;  %1710 = vmatpush1.bf16.msra.mxu1 %v1709_v27  ;;  %v421_v45 = vld [vmem:[#allocation4 + $0xa0] sm:$0xff]  ;;  %v423_v48 = vld [vmem:[#allocation4 + $0xb0] sm:$0xff] }
  0x42   :  { %600 = vmatprep.mubr.f32.mxu1 %v2239_v0  ;;  %1712 = vmatprep.subr.bf16.mxu1 %v1711_v32  ;;  %v1715_v47 = vpack.c.bf16 %v424_v42, %v420_v41  ;;  %v426_v49 = vld [vmem:[#allocation4 + $0xc8] sm:$0xff]  ;;  %v1685_v51 = vpack.c.bf16 %v421_v45, %v417_v43  ;;  %v428_v52 = vld [vmem:[#allocation4 + $0xd8] sm:$0xff]  ;;  %v425_v55 = vld [vmem:[#allocation4 + $0xc0] sm:$0xff]  ;;  %v1717_v57 = vpack.c.bf16 %v423_v48, %v419_v46 }
  0x43   :  { %v430_v50 = vld [vmem:[#allocation4 + $0xe8] sm:$0xff]  ;;  %1682 = vmatpush1.bf16.msra.mxu0 %v1681_v36  ;;  %v432_v53 = vld [vmem:[#allocation4 + $0xf8] sm:$0xff]  ;;  %v429_v56 = vld [vmem:[#allocation4 + $0xe0] sm:$0xff] }
  0x44   :  { %1684 = vmatprep.subr.bf16.mxu0 %v1683_v40  ;;  %v1687_v54 = vpack.c.bf16 %v430_v50, %v426_v49  ;;  %v434_v58 = vld [vmem:[#allocation4 + $0x108] sm:$0xff]  ;;  %v1719_v60 = vpack.c.bf16 %v432_v53, %v428_v52  ;;  %v427_v61 = vld [vmem:[#allocation4 + $0xd0] sm:$0xff]  ;;  %v1689_v63 = vpack.c.bf16 %v429_v56, %v425_v55  ;;  %v436_v1 = vld [vmem:[#allocation4 + $0x118] sm:$0xff] }
  0x45   :  { %1714 = vmatpush1.bf16.msra.mxu1 %v1713_v44  ;;  %v438_v59 = vld [vmem:[#allocation4 + $0x128] sm:$0xff]  ;;  %v431_v62 = vld [vmem:[#allocation4 + $0xf0] sm:$0xff]  ;;  %v440_v2 = vld [vmem:[#allocation4 + $0x138] sm:$0xff] }
  0x46   :  { %1716 = vmatprep.subr.bf16.mxu1 %v1715_v47  ;;  %v1691_v3 = vpack.c.bf16 %v438_v59, %v434_v58  ;;  %v433_v4 = vld [vmem:[#allocation4 + $0x100] sm:$0xff]  ;;  %v1721_v6 = vpack.c.bf16 %v431_v62, %v427_v61  ;;  %v442_v7 = vld [vmem:[#allocation4 + $0x148] sm:$0xff]  ;;  %v1723_v9 = vpack.c.bf16 %v440_v2, %v436_v1  ;;  %v435_v10 = vld [vmem:[#allocation4 + $0x110] sm:$0xff] }
  0x47   :  { %1686 = vmatpush1.bf16.msra.mxu0 %v1685_v51  ;;  %v437_v5 = vld [vmem:[#allocation4 + $0x120] sm:$0xff]  ;;  %v446_v8 = vld [vmem:[#allocation4 + $0x168] sm:$0xff]  ;;  %v439_v11 = vld [vmem:[#allocation4 + $0x130] sm:$0xff] }
  0x48   :  { %1688 = vmatprep.subr.bf16.mxu0 %v1687_v54  ;;  %v1693_v12 = vpack.c.bf16 %v437_v5, %v433_v4  ;;  %v444_v13 = vld [vmem:[#allocation4 + $0x158] sm:$0xff]  ;;  %v1695_v15 = vpack.c.bf16 %v446_v8, %v442_v7  ;;  %v441_v16 = vld [vmem:[#allocation4 + $0x140] sm:$0xff]  ;;  %v1725_v18 = vpack.c.bf16 %v439_v11, %v435_v10  ;;  %v450_v19 = vld [vmem:[#allocation4 + $0x188] sm:$0xff] }
  0x49   :  { %1718 = vmatpush1.bf16.msra.mxu1 %v1717_v57  ;;  %v448_v14 = vld [vmem:[#allocation4 + $0x178] sm:$0xff]  ;;  %v445_v17 = vld [vmem:[#allocation4 + $0x160] sm:$0xff]  ;;  %v454_v20 = vld [vmem:[#allocation4 + $0x1a8] sm:$0xff] }
  0x4a   :  { %1720 = vmatprep.subr.bf16.mxu1 %v1719_v60  ;;  %v1727_v21 = vpack.c.bf16 %v448_v14, %v444_v13  ;;  %v443_v22 = vld [vmem:[#allocation4 + $0x150] sm:$0xff]  ;;  %v1697_v24 = vpack.c.bf16 %v445_v17, %v441_v16  ;;  %v452_v25 = vld [vmem:[#allocation4 + $0x198] sm:$0xff]  ;;  %v1699_v27 = vpack.c.bf16 %v454_v20, %v450_v19  ;;  %v449_v28 = vld [vmem:[#allocation4 + $0x180] sm:$0xff] }
  0x4b   :  { %1690 = vmatpush1.bf16.msra.mxu0 %v1689_v63  ;;  %v447_v23 = vld [vmem:[#allocation4 + $0x170] sm:$0xff]  ;;  %v456_v26 = vld [vmem:[#allocation4 + $0x1b8] sm:$0xff]  ;;  %v453_v29 = vld [vmem:[#allocation4 + $0x1a0] sm:$0xff] }
  0x4c   :  { %1692 = vmatprep.subr.bf16.mxu0 %v1691_v3  ;;  %v1729_v30 = vpack.c.bf16 %v447_v23, %v443_v22  ;;  %v458_v31 = vld [vmem:[#allocation4 + $0x1c8] sm:$0xff]  ;;  %v1731_v33 = vpack.c.bf16 %v456_v26, %v452_v25  ;;  %v451_v34 = vld [vmem:[#allocation4 + $0x190] sm:$0xff]  ;;  %v1701_v36 = vpack.c.bf16 %v453_v29, %v449_v28  ;;  %v460_v37 = vld [vmem:[#allocation4 + $0x1d8] sm:$0xff] }
  0x4d   :  { %1722 = vmatpush1.bf16.msra.mxu1 %v1721_v6  ;;  %v462_v32 = vld [vmem:[#allocation4 + $0x1e8] sm:$0xff]  ;;  %v455_v35 = vld [vmem:[#allocation4 + $0x1b0] sm:$0xff]  ;;  %v464_v38 = vld [vmem:[#allocation4 + $0x1f8] sm:$0xff] }
  0x4e   :  { %1724 = vmatprep.subr.bf16.mxu1 %v1723_v9  ;;  %v1703_v39 = vpack.c.bf16 %v462_v32, %v458_v31  ;;  %v457_v40 = vld [vmem:[#allocation4 + $0x1c0] sm:$0xff]  ;;  %v1733_v42 = vpack.c.bf16 %v455_v35, %v451_v34  ;;  %v274_v43 = vld [vmem:[#allocation2 + $0x8] sm:$0xff]  ;;  %v1735_v45 = vpack.c.bf16 %v464_v38, %v460_v37  ;;  %v459_v46 = vld [vmem:[#allocation4 + $0x1d0] sm:$0xff] }
  0x4f   :  { %1694 = vmatpush1.bf16.msra.mxu0 %v1693_v12  ;;  %v461_v41 = vld [vmem:[#allocation4 + $0x1e0] sm:$0xff]  ;;  %v278_v44 = vld [vmem:[#allocation2 + $0x28] sm:$0xff]  ;;  %v463_v47 = vld [vmem:[#allocation4 + $0x1f0] sm:$0xff] }
  0x50   :  { %1696 = vmatprep.subr.bf16.mxu0 %v1695_v15  ;;  %v1705_v48 = vpack.c.bf16 %v461_v41, %v457_v40  ;;  %v276_v49 = vld [vmem:[#allocation2 + $0x18] sm:$0xff]  ;;  %v1739_v51 = vpack.c.bf16 %v278_v44, %v274_v43  ;;  %v273_v52 = vld [vmem:[#allocation2] sm:$0xff]  ;;  %v1737_v54 = vpack.c.bf16 %v463_v47, %v459_v46  ;;  %v282_v55 = vld [vmem:[#allocation2 + $0x48] sm:$0xff] }
  0x51   :  { %1726 = vmatpush1.bf16.msra.mxu1 %v1725_v18  ;;  %v280_v50 = vld [vmem:[#allocation2 + $0x38] sm:$0xff]  ;;  %v277_v53 = vld [vmem:[#allocation2 + $0x20] sm:$0xff]  ;;  %v286_v56 = vld [vmem:[#allocation2 + $0x68] sm:$0xff] }
  0x52   :  { %1728 = vmatprep.subr.bf16.mxu1 %v1727_v21  ;;  %v1803_v57 = vpack.c.bf16 %v280_v50, %v276_v49  ;;  %v275_v58 = vld [vmem:[#allocation2 + $0x10] sm:$0xff]  ;;  %v76_v60 = vld [vmem:[%s2486_s1] sm:$0xff]  ;;  %v1741_v61 = vpack.c.bf16 %v277_v53, %v273_v52  ;;  %v284_v62 = vld [vmem:[#allocation2 + $0x58] sm:$0xff]  ;;  %v1743_v1 = vpack.c.bf16 %v286_v56, %v282_v55 }
  0x53   :  { %1698 = vmatpush1.bf16.msra.mxu0 %v1697_v24  ;;  %v279_v59 = vld [vmem:[#allocation2 + $0x30] sm:$0xff]  ;;  %v288_v63 = vld [vmem:[#allocation2 + $0x78] sm:$0xff]  ;;  %v281_v2 = vld [vmem:[#allocation2 + $0x40] sm:$0xff] }
  0x54   :  { %1700 = vmatprep.subr.bf16.mxu0 %v1699_v27  ;;  %v285_v3 = vld [vmem:[#allocation2 + $0x60] sm:$0xff]  ;;  %v1805_v4 = vpack.c.bf16 %v279_v59, %v275_v58  ;;  %v290_v5 = vld [vmem:[#allocation2 + $0x88] sm:$0xff]  ;;  %v1807_v7 = vpack.c.bf16 %v288_v63, %v284_v62  ;;  %v283_v8 = vld [vmem:[#allocation2 + $0x50] sm:$0xff] }
  0x55   :  { %1730 = vmatpush1.bf16.msra.mxu1 %v1729_v30  ;;  %v294_v6 = vld [vmem:[#allocation2 + $0xa8] sm:$0xff]  ;;  %v287_v9 = vld [vmem:[#allocation2 + $0x70] sm:$0xff]  ;;  %v1745_v10 = vpack.c.bf16 %v285_v3, %v281_v2  ;;  %v292_v11 = vld [vmem:[#allocation2 + $0x98] sm:$0xff] }
  0x56   :  { %1732 = vmatprep.subr.bf16.mxu1 %v1731_v33  ;;  %v296_v12 = vld [vmem:[#allocation2 + $0xb8] sm:$0xff]  ;;  %v1747_v13 = vpack.c.bf16 %v294_v6, %v290_v5  ;;  %v289_v14 = vld [vmem:[#allocation2 + $0x80] sm:$0xff]  ;;  %v1809_v16 = vpack.c.bf16 %v287_v9, %v283_v8  ;;  %v298_v17 = vld [vmem:[#allocation2 + $0xc8] sm:$0xff] }
  0x57   :  { %1702 = vmatpush1.bf16.msra.mxu0 %v1701_v36  ;;  %v293_v15 = vld [vmem:[#allocation2 + $0xa0] sm:$0xff]  ;;  %v302_v18 = vld [vmem:[#allocation2 + $0xe8] sm:$0xff]  ;;  %v1811_v19 = vpack.c.bf16 %v296_v12, %v292_v11  ;;  %v291_v20 = vld [vmem:[#allocation2 + $0x90] sm:$0xff] }
  0x58   :  { %1704 = vmatprep.subr.bf16.mxu0 %v1703_v39  ;;  %v295_v21 = vld [vmem:[#allocation2 + $0xb0] sm:$0xff]  ;;  %v1749_v22 = vpack.c.bf16 %v293_v15, %v289_v14  ;;  %v300_v23 = vld [vmem:[#allocation2 + $0xd8] sm:$0xff]  ;;  %v1751_v25 = vpack.c.bf16 %v302_v18, %v298_v17  ;;  %v297_v26 = vld [vmem:[#allocation2 + $0xc0] sm:$0xff] }
  0x59   :  { %1734 = vmatpush1.bf16.msra.mxu1 %v1733_v42  ;;  %v304_v24 = vld [vmem:[#allocation2 + $0xf8] sm:$0xff]  ;;  %v301_v27 = vld [vmem:[#allocation2 + $0xe0] sm:$0xff]  ;;  %v1813_v28 = vpack.c.bf16 %v295_v21, %v291_v20  ;;  %v306_v29 = vld [vmem:[#allocation2 + $0x108] sm:$0xff] }
  0x5a   :  { %1736 = vmatprep.subr.bf16.mxu1 %v1735_v45  ;;  %v310_v30 = vld [vmem:[#allocation2 + $0x128] sm:$0xff]  ;;  %v1815_v31 = vpack.c.bf16 %v304_v24, %v300_v23  ;;  %v299_v32 = vld [vmem:[#allocation2 + $0xd0] sm:$0xff]  ;;  %v1753_v34 = vpack.c.bf16 %v301_v27, %v297_v26  ;;  %v308_v35 = vld [vmem:[#allocation2 + $0x118] sm:$0xff] }
  0x5b   :  { %1706 = vmatpush1.bf16.msra.mxu0 %v1705_v48  ;;  %v303_v33 = vld [vmem:[#allocation2 + $0xf0] sm:$0xff]  ;;  %v312_v36 = vld [vmem:[#allocation2 + $0x138] sm:$0xff]  ;;  %v1755_v37 = vpack.c.bf16 %v310_v30, %v306_v29  ;;  %v305_v38 = vld [vmem:[#allocation2 + $0x100] sm:$0xff] }
  0x5c   :  { %1740 = vmatprep.subr.bf16.mxu0 %v1739_v51  ;;  %v309_v39 = vld [vmem:[#allocation2 + $0x120] sm:$0xff]  ;;  %v1817_v40 = vpack.c.bf16 %v303_v33, %v299_v32  ;;  %v314_v41 = vld [vmem:[#allocation2 + $0x148] sm:$0xff]  ;;  %v1819_v43 = vpack.c.bf16 %v312_v36, %v308_v35  ;;  %v307_v44 = vld [vmem:[#allocation2 + $0x110] sm:$0xff] }
  0x5d   :  { %1738 = vmatpush1.bf16.msra.mxu1 %v1737_v54  ;;  %v318_v42 = vld [vmem:[#allocation2 + $0x168] sm:$0xff]  ;;  %v311_v45 = vld [vmem:[#allocation2 + $0x130] sm:$0xff]  ;;  %v1757_v46 = vpack.c.bf16 %v309_v39, %v305_v38  ;;  %v316_v47 = vld [vmem:[#allocation2 + $0x158] sm:$0xff] }
  0x5e   :  { %1804 = vmatprep.subr.bf16.mxu1 %v1803_v57  ;;  %530 = vmatmul.mubr.f32.vlgmr.msra.gmra.mrb[2].mxu0 %v76_v60  ;;  %v320_v48 = vld [vmem:[#allocation2 + $0x178] sm:$0xff]  ;;  %v1759_v49 = vpack.c.bf16 %v318_v42, %v314_v41  ;;  %v313_v50 = vld [vmem:[#allocation2 + $0x140] sm:$0xff]  ;;  %v1821_v52 = vpack.c.bf16 %v311_v45, %v307_v44  ;;  %v322_v53 = vld [vmem:[#allocation2 + $0x188] sm:$0xff] }
  0x5f   :  { %1742 = vmatpush1.bf16.msra.mxu0 %v1741_v61  ;;  %v317_v51 = vld [vmem:[#allocation2 + $0x160] sm:$0xff]  ;;  %v326_v54 = vld [vmem:[#allocation2 + $0x1a8] sm:$0xff]  ;;  %v1823_v55 = vpack.c.bf16 %v320_v48, %v316_v47  ;;  %v315_v56 = vld [vmem:[#allocation2 + $0x150] sm:$0xff] }
  0x60   :  { %601 = vmatmul.mubr.f32.vlgmr.msra.gmra.mrb[2].mxu1 %v76_v60  ;;  %1744 = vmatprep.subr.bf16.mxu0 %v1743_v1  ;;  %v319_v57 = vld [vmem:[#allocation2 + $0x170] sm:$0xff]  ;;  %v1761_v58 = vpack.c.bf16 %v317_v51, %v313_v50  ;;  %v324_v59 = vld [vmem:[#allocation2 + $0x198] sm:$0xff]  ;;  %v1763_v61 = vpack.c.bf16 %v326_v54, %v322_v53  ;;  %v321_v62 = vld [vmem:[#allocation2 + $0x180] sm:$0xff] }
  0x61   :  { %1806 = vmatpush1.bf16.msra.mxu1 %v1805_v4  ;;  %v328_v60 = vld [vmem:[#allocation2 + $0x1b8] sm:$0xff]  ;;  %v325_v63 = vld [vmem:[#allocation2 + $0x1a0] sm:$0xff]  ;;  %v1825_v1 = vpack.c.bf16 %v319_v57, %v315_v56  ;;  %v330_v2 = vld [vmem:[#allocation2 + $0x1c8] sm:$0xff] }
  0x62   :  { %1808 = vmatprep.subr.bf16.mxu1 %v1807_v7  ;;  %v334_v3 = vld [vmem:[#allocation2 + $0x1e8] sm:$0xff]  ;;  %v1827_v4 = vpack.c.bf16 %v328_v60, %v324_v59  ;;  %v323_v5 = vld [vmem:[#allocation2 + $0x190] sm:$0xff]  ;;  %v1765_v7 = vpack.c.bf16 %v325_v63, %v321_v62  ;;  %v332_v8 = vld [vmem:[#allocation2 + $0x1d8] sm:$0xff] }
  0x63   :  { %1746 = vmatpush1.bf16.msra.mxu0 %v1745_v10  ;;  %v327_v6 = vld [vmem:[#allocation2 + $0x1b0] sm:$0xff]  ;;  %v336_v9 = vld [vmem:[#allocation2 + $0x1f8] sm:$0xff]  ;;  %v1767_v10 = vpack.c.bf16 %v334_v3, %v330_v2  ;;  %v329_v11 = vld [vmem:[#allocation2 + $0x1c0] sm:$0xff] }
  0x64   :  { %1748 = vmatprep.subr.bf16.mxu0 %v1747_v13  ;;  %v333_v12 = vld [vmem:[#allocation2 + $0x1e0] sm:$0xff]  ;;  %v1829_v13 = vpack.c.bf16 %v327_v6, %v323_v5  ;;  %v338_v14 = vld [vmem:[#allocation2 + $0x208] sm:$0xff]  ;;  %v331_v17 = vld [vmem:[#allocation2 + $0x1d0] sm:$0xff] }
  0x65   :  { %1810 = vmatpush1.bf16.msra.mxu1 %v1809_v16  ;;  %v342_v15 = vld [vmem:[#allocation2 + $0x228] sm:$0xff]  ;;  %v1831_v16 = vpack.c.bf16 %v336_v9, %v332_v8  ;;  %v335_v18 = vld [vmem:[#allocation2 + $0x1f0] sm:$0xff]  ;;  %v340_v20 = vld [vmem:[#allocation2 + $0x218] sm:$0xff] }
  0x66   :  { %1812 = vmatprep.subr.bf16.mxu1 %v1811_v19  ;;  %v1769_v19 = vpack.c.bf16 %v333_v12, %v329_v11  ;;  %v344_v21 = vld [vmem:[#allocation2 + $0x238] sm:$0xff]  ;;  %v337_v23 = vld [vmem:[#allocation2 + $0x200] sm:$0xff]  ;;  %v346_v26 = vld [vmem:[#allocation2 + $0x248] sm:$0xff] }
  0x67   :  { %1750 = vmatpush1.bf16.msra.mxu0 %v1749_v22  ;;  %v1771_v22 = vpack.c.bf16 %v342_v15, %v338_v14  ;;  %v341_v24 = vld [vmem:[#allocation2 + $0x220] sm:$0xff]  ;;  %v350_v27 = vld [vmem:[#allocation2 + $0x268] sm:$0xff]  ;;  %v339_v29 = vld [vmem:[#allocation2 + $0x210] sm:$0xff] }
  0x68   :  { %1752 = vmatprep.subr.bf16.mxu0 %v1751_v25  ;;  %v1833_v25 = vpack.c.bf16 %v335_v18, %v331_v17  ;;  %v343_v30 = vld [vmem:[#allocation2 + $0x230] sm:$0xff]  ;;  %v348_v32 = vld [vmem:[#allocation2 + $0x258] sm:$0xff]  ;;  %v345_v35 = vld [vmem:[#allocation2 + $0x240] sm:$0xff] }
  0x69   :  { %1814 = vmatpush1.bf16.msra.mxu1 %v1813_v28  ;;  %v1835_v28 = vpack.c.bf16 %v344_v21, %v340_v20  ;;  %v352_v33 = vld [vmem:[#allocation2 + $0x278] sm:$0xff]  ;;  %v349_v36 = vld [vmem:[#allocation2 + $0x260] sm:$0xff]  ;;  %v354_v38 = vld [vmem:[#allocation2 + $0x288] sm:$0xff] }
  0x6a   :  { %1816 = vmatprep.subr.bf16.mxu1 %v1815_v31  ;;  %v1773_v31 = vpack.c.bf16 %v341_v24, %v337_v23  ;;  %v358_v39 = vld [vmem:[#allocation2 + $0x2a8] sm:$0xff]  ;;  %v347_v41 = vld [vmem:[#allocation2 + $0x250] sm:$0xff]  ;;  %v356_v44 = vld [vmem:[#allocation2 + $0x298] sm:$0xff] }
  0x6b   :  { %1754 = vmatpush1.bf16.msra.mxu0 %v1753_v34  ;;  %v1775_v34 = vpack.c.bf16 %v350_v27, %v346_v26  ;;  %v351_v42 = vld [vmem:[#allocation2 + $0x270] sm:$0xff]  ;;  %v360_v45 = vld [vmem:[#allocation2 + $0x2b8] sm:$0xff]  ;;  %v353_v47 = vld [vmem:[#allocation2 + $0x280] sm:$0xff] }
  0x6c   :  { %1756 = vmatprep.subr.bf16.mxu0 %v1755_v37  ;;  %v1837_v37 = vpack.c.bf16 %v343_v30, %v339_v29  ;;  %v357_v48 = vld [vmem:[#allocation2 + $0x2a0] sm:$0xff]  ;;  %v362_v50 = vld [vmem:[#allocation2 + $0x2c8] sm:$0xff]  ;;  %v355_v53 = vld [vmem:[#allocation2 + $0x290] sm:$0xff] }
  0x6d   :  { %1818 = vmatpush1.bf16.msra.mxu1 %v1817_v40  ;;  %v1839_v40 = vpack.c.bf16 %v352_v33, %v348_v32  ;;  %v366_v51 = vld [vmem:[#allocation2 + $0x2e8] sm:$0xff]  ;;  %v359_v54 = vld [vmem:[#allocation2 + $0x2b0] sm:$0xff]  ;;  %v364_v56 = vld [vmem:[#allocation2 + $0x2d8] sm:$0xff] }
  0x6e   :  { %1820 = vmatprep.subr.bf16.mxu1 %v1819_v43  ;;  %v1777_v43 = vpack.c.bf16 %v349_v36, %v345_v35  ;;  %v368_v57 = vld [vmem:[#allocation2 + $0x2f8] sm:$0xff]  ;;  %v361_v59 = vld [vmem:[#allocation2 + $0x2c0] sm:$0xff]  ;;  %v370_v62 = vld [vmem:[#allocation2 + $0x308] sm:$0xff] }
  0x6f   :  { %1758 = vmatpush1.bf16.msra.mxu0 %v1757_v46  ;;  %v1779_v46 = vpack.c.bf16 %v358_v39, %v354_v38  ;;  %v365_v60 = vld [vmem:[#allocation2 + $0x2e0] sm:$0xff]  ;;  %v374_v63 = vld [vmem:[#allocation2 + $0x328] sm:$0xff]  ;;  %v363_v2 = vld [vmem:[#allocation2 + $0x2d0] sm:$0xff] }
  0x70   :  { %1760 = vmatprep.subr.bf16.mxu0 %v1759_v49  ;;  %v1841_v49 = vpack.c.bf16 %v351_v42, %v347_v41  ;;  %v367_v3 = vld [vmem:[#allocation2 + $0x2f0] sm:$0xff]  ;;  %v372_v5 = vld [vmem:[#allocation2 + $0x318] sm:$0xff]  ;;  %v369_v8 = vld [vmem:[#allocation2 + $0x300] sm:$0xff] }
  0x71   :  { %1822 = vmatpush1.bf16.msra.mxu1 %v1821_v52  ;;  %v1843_v52 = vpack.c.bf16 %v360_v45, %v356_v44  ;;  %v376_v6 = vld [vmem:[#allocation2 + $0x338] sm:$0xff]  ;;  %v373_v9 = vld [vmem:[#allocation2 + $0x320] sm:$0xff]  ;;  %v378_v11 = vld [vmem:[#allocation2 + $0x348] sm:$0xff] }
  0x72   :  { %1824 = vmatprep.subr.bf16.mxu1 %v1823_v55  ;;  %v1781_v55 = vpack.c.bf16 %v357_v48, %v353_v47  ;;  %v382_v12 = vld [vmem:[#allocation2 + $0x368] sm:$0xff]  ;;  %v371_v14 = vld [vmem:[#allocation2 + $0x310] sm:$0xff]  ;;  %v380_v17 = vld [vmem:[#allocation2 + $0x358] sm:$0xff] }
  0x73   :  { %1762 = vmatpush1.bf16.msra.mxu0 %v1761_v58  ;;  %v1783_v58 = vpack.c.bf16 %v366_v51, %v362_v50  ;;  %v375_v15 = vld [vmem:[#allocation2 + $0x330] sm:$0xff]  ;;  %v384_v18 = vld [vmem:[#allocation2 + $0x378] sm:$0xff]  ;;  %v377_v20 = vld [vmem:[#allocation2 + $0x340] sm:$0xff] }
  0x74   :  { %1764 = vmatprep.subr.bf16.mxu0 %v1763_v61  ;;  %v1845_v61 = vpack.c.bf16 %v359_v54, %v355_v53  ;;  %v381_v21 = vld [vmem:[#allocation2 + $0x360] sm:$0xff]  ;;  %v386_v23 = vld [vmem:[#allocation2 + $0x388] sm:$0xff]  ;;  %v379_v26 = vld [vmem:[#allocation2 + $0x350] sm:$0xff] }
  0x75   :  { %1826 = vmatpush1.bf16.msra.mxu1 %v1825_v1  ;;  %v1847_v1 = vpack.c.bf16 %v368_v57, %v364_v56  ;;  %v390_v24 = vld [vmem:[#allocation2 + $0x3a8] sm:$0xff]  ;;  %v383_v27 = vld [vmem:[#allocation2 + $0x370] sm:$0xff]  ;;  %v388_v29 = vld [vmem:[#allocation2 + $0x398] sm:$0xff] }
  0x76   :  { %1828 = vmatprep.subr.bf16.mxu1 %v1827_v4  ;;  %v1785_v4 = vpack.c.bf16 %v365_v60, %v361_v59  ;;  %v392_v30 = vld [vmem:[#allocation2 + $0x3b8] sm:$0xff]  ;;  %v385_v32 = vld [vmem:[#allocation2 + $0x380] sm:$0xff]  ;;  %v394_v35 = vld [vmem:[#allocation2 + $0x3c8] sm:$0xff] }
  0x77   :  { %1766 = vmatpush1.bf16.msra.mxu0 %v1765_v7  ;;  %v1787_v7 = vpack.c.bf16 %v374_v63, %v370_v62  ;;  %v389_v33 = vld [vmem:[#allocation2 + $0x3a0] sm:$0xff]  ;;  %v398_v36 = vld [vmem:[#allocation2 + $0x3e8] sm:$0xff]  ;;  %v387_v38 = vld [vmem:[#allocation2 + $0x390] sm:$0xff] }
  0x78   :  { %1768 = vmatprep.subr.bf16.mxu0 %v1767_v10  ;;  %v1849_v10 = vpack.c.bf16 %v367_v3, %v363_v2  ;;  %v391_v39 = vld [vmem:[#allocation2 + $0x3b0] sm:$0xff]  ;;  %v396_v41 = vld [vmem:[#allocation2 + $0x3d8] sm:$0xff]  ;;  %v393_v44 = vld [vmem:[#allocation2 + $0x3c0] sm:$0xff] }
  0x79   :  { %1830 = vmatpush1.bf16.msra.mxu1 %v1829_v13  ;;  %v1851_v13 = vpack.c.bf16 %v376_v6, %v372_v5  ;;  %v400_v42 = vld [vmem:[#allocation2 + $0x3f8] sm:$0xff]  ;;  %v397_v45 = vld [vmem:[#allocation2 + $0x3e0] sm:$0xff]  ;;  %v930_v47 = vld [vmem:[#allocation4 + $0x208] sm:$0xff] }
  0x7a   :  { %1832 = vmatprep.subr.bf16.mxu1 %v1831_v16  ;;  %v1789_v16 = vpack.c.bf16 %v373_v9, %v369_v8  ;;  %v934_v48 = vld [vmem:[#allocation4 + $0x228] sm:$0xff]  ;;  %v395_v50 = vld [vmem:[#allocation2 + $0x3d0] sm:$0xff]  ;;  %v932_v53 = vld [vmem:[#allocation4 + $0x218] sm:$0xff] }
  0x7b   :  { %1770 = vmatpush1.bf16.msra.mxu0 %v1769_v19  ;;  %v1791_v19 = vpack.c.bf16 %v382_v12, %v378_v11  ;;  %v399_v51 = vld [vmem:[#allocation2 + $0x3f0] sm:$0xff]  ;;  %v936_v54 = vld [vmem:[#allocation4 + $0x238] sm:$0xff]  ;;  %v929_v3 = vld [vmem:[#allocation4 + $0x200] sm:$0xff] }
  0x7c   :  { %1772 = vmatprep.subr.bf16.mxu0 %v1771_v22  ;;  %v1853_v22 = vpack.c.bf16 %v375_v15, %v371_v14  ;;  %v1865_v56 = vpack.c.bf16 %v399_v51, %v395_v50  ;;  %v1899_v57 = vpack.c.bf16 %v936_v54, %v932_v53  ;;  %v935_v8 = vld [vmem:[#allocation4 + $0x230] sm:$0xff]  ;;  %v938_v9 = vld [vmem:[#allocation4 + $0x248] sm:$0xff]  ;;  %v940_v12 = vld [vmem:[#allocation4 + $0x258] sm:$0xff] }
  0x7d   :  { %1834 = vmatpush1.bf16.msra.mxu1 %v1833_v25  ;;  %v1855_v25 = vpack.c.bf16 %v384_v18, %v380_v17  ;;  %v942_v11 = vld [vmem:[#allocation4 + $0x268] sm:$0xff]  ;;  %v968_v53 = vld [vmem:[#allocation4 + $0x338] sm:$0xff] }
  0x7e   :  { %1836 = vmatprep.subr.bf16.mxu1 %v1835_v28  ;;  %v1793_v28 = vpack.c.bf16 %v381_v21, %v377_v20  ;;  %v941_v20 = vld [vmem:[#allocation4 + $0x260] sm:$0xff]  ;;  %v962_v50 = vld [vmem:[#allocation4 + $0x308] sm:$0xff] }
  0x7f   :  { %1774 = vmatpush1.bf16.msra.mxu0 %v1773_v31  ;;  %v1795_v31 = vpack.c.bf16 %v390_v24, %v386_v23  ;;  %v939_v24 = vld [vmem:[#allocation4 + $0x250] sm:$0xff]  ;;  %v966_v51 = vld [vmem:[#allocation4 + $0x328] sm:$0xff] }
  0x80   :  { %1776 = vmatprep.subr.bf16.mxu0 %v1775_v34  ;;  %v1857_v34 = vpack.c.bf16 %v383_v27, %v379_v26  ;;  %v946_v26 = vld [vmem:[#allocation4 + $0x288] sm:$0xff] }
  0x81   :  { %1838 = vmatpush1.bf16.msra.mxu1 %v1837_v37  ;;  %v1859_v37 = vpack.c.bf16 %v392_v30, %v388_v29  ;;  %v950_v27 = vld [vmem:[#allocation4 + $0x2a8] sm:$0xff]  ;;  %v952_v29 = vld [vmem:[#allocation4 + $0x2b8] sm:$0xff] }
  0x82   :  { %1840 = vmatprep.subr.bf16.mxu1 %v1839_v40  ;;  %v1797_v40 = vpack.c.bf16 %v389_v33, %v385_v32  ;;  %v945_v32 = vld [vmem:[#allocation4 + $0x280] sm:$0xff] }
  0x83   :  { %1778 = vmatpush1.bf16.msra.mxu0 %v1777_v43  ;;  %v1799_v43 = vpack.c.bf16 %v398_v36, %v394_v35  ;;  %v949_v33 = vld [vmem:[#allocation4 + $0x2a0] sm:$0xff]  ;;  %v947_v36 = vld [vmem:[#allocation4 + $0x290] sm:$0xff] }
  0x84   :  { %1780 = vmatprep.subr.bf16.mxu0 %v1779_v46  ;;  %v1861_v46 = vpack.c.bf16 %v391_v39, %v387_v38  ;;  %v954_v38 = vld [vmem:[#allocation4 + $0x2c8] sm:$0xff] }
  0x85   :  { %1842 = vmatpush1.bf16.msra.mxu1 %v1841_v49  ;;  %v1863_v49 = vpack.c.bf16 %v400_v42, %v396_v41  ;;  %v958_v39 = vld [vmem:[#allocation4 + $0x2e8] sm:$0xff]  ;;  %v960_v41 = vld [vmem:[#allocation4 + $0x2f8] sm:$0xff]  ;;  %v1877_v42 = vpack.c.bf16 %v949_v33, %v945_v32 }
  0x86   :  { %1844 = vmatprep.subr.bf16.mxu1 %v1843_v52  ;;  %v1801_v52 = vpack.c.bf16 %v397_v45, %v393_v44  ;;  %v953_v44 = vld [vmem:[#allocation4 + $0x2c0] sm:$0xff]  ;;  %v988_v32 = vld [vmem:[#allocation4 + $0x3d8] sm:$0xff] }
  0x87   :  { %1782 = vmatpush1.bf16.msra.mxu0 %v1781_v55  ;;  %v1867_v55 = vpack.c.bf16 %v934_v48, %v930_v47  ;;  %v957_v45 = vld [vmem:[#allocation4 + $0x2e0] sm:$0xff]  ;;  %v955_v48 = vld [vmem:[#allocation4 + $0x2d0] sm:$0xff]  ;;  %v992_v33 = vld [vmem:[#allocation4 + $0x3f8] sm:$0xff] }
  0x88   :  { %1784 = vmatprep.subr.bf16.mxu0 %v1783_v58  ;;  %v90_v58 = vlaneseq  ;;  %v1881_v54 = vpack.c.bf16 %v957_v45, %v953_v44  ;;  %v805_v44 = vld [vmem:[#allocation2 + $0x428] sm:$0xff]  ;;  %v803_v45 = vld [vmem:[#allocation2 + $0x418] sm:$0xff] }
  0x89   :  { %1846 = vmatpush1.bf16.msra.mxu1 %v1845_v61  ;;  %v2398_v61 = vld [vmem:[%s2488_s3] sm:$0xf] }
  0x8a   :  { %1848 = vmatprep.subr.bf16.mxu1 %v1847_v1  ;;  %v2390_v59 = vshrl.u32 %v90_v58, 7 }
  0x8b   :  { %1786 = vmatpush1.bf16.msra.mxu0 %v1785_v4  ;;  %v933_v4 = vld [vmem:[#allocation4 + $0x220] sm:$0xff] }
  0x8c   :  { %1788 = vmatprep.subr.bf16.mxu0 %v1787_v7  ;;  %v2393_v60 = vsub.s32 0, %v2390_v59  ;;  %v2401_v62 = vsub.s32 1, %v2390_v59  ;;  %v931_v7 = vld [vmem:[#allocation4 + $0x210] sm:$0xff]  ;;  %v1869_v17 = vpack.c.bf16 %v933_v4, %v929_v3  ;;  %v970_v4 = vld [vmem:[#allocation4 + $0x348] sm:$0xff] }
  0x8d   :  { %1850 = vmatpush1.bf16.msra.mxu1 %v1849_v10  ;;  %v1901_v18 = vpack.c.bf16 %v935_v8, %v931_v7  ;;  %v967_v3 = vld [vmem:[#allocation4 + $0x330] sm:$0xff]  ;;  %v976_v7 = vld [vmem:[#allocation4 + $0x378] sm:$0xff] }
  0x8e   :  { %1852 = vmatprep.subr.bf16.mxu1 %v1851_v13  ;;  %v93_v63 = vrot.slane %v2398_v61, %v2393_v60  ;;  %v97_v1 = vrot.slane %v2398_v61, %v2401_v62  ;;  %v944_v13 = vld [vmem:[#allocation4 + $0x278] sm:$0xff] }
  0x8f   :  { %1790 = vmatpush1.bf16.msra.mxu0 %v1789_v16  ;;  %v1903_v23 = vpack.c.bf16 %v944_v13, %v940_v12 }
  0x90   :  { %1792 = vmatprep.subr.bf16.mxu0 %v1791_v19  ;;  %v937_v19 = vld [vmem:[#allocation4 + $0x240] sm:$0xff] }
  0x91   :  { %1854 = vmatpush1.bf16.msra.mxu1 %v1853_v22  ;;  %v1871_v22 = vpack.c.bf16 %v942_v11, %v938_v9  ;;  %v1873_v30 = vpack.c.bf16 %v941_v20, %v937_v19  ;;  %v973_v11 = vld [vmem:[#allocation4 + $0x360] sm:$0xff]  ;;  %v982_v19 = vld [vmem:[#allocation4 + $0x3a8] sm:$0xff]  ;;  %v980_v20 = vld [vmem:[#allocation4 + $0x398] sm:$0xff] }
  0x92   :  { %1856 = vmatprep.subr.bf16.mxu1 %v1855_v25  ;;  %v943_v25 = vld [vmem:[#allocation4 + $0x270] sm:$0xff] }
  0x93   :  { %1794 = vmatpush1.bf16.msra.mxu0 %v1793_v28  ;;  %v948_v28 = vld [vmem:[#allocation4 + $0x298] sm:$0xff] }
  0x94   :  { %1796 = vmatprep.subr.bf16.mxu0 %v1795_v31  ;;  %v1905_v31 = vpack.c.bf16 %v943_v25, %v939_v24  ;;  %v1907_v35 = vpack.c.bf16 %v952_v29, %v948_v28  ;;  %v977_v24 = vld [vmem:[#allocation4 + $0x380] sm:$0xff]  ;;  %v979_v28 = vld [vmem:[#allocation4 + $0x390] sm:$0xff] }
  0x95   :  { %1858 = vmatpush1.bf16.msra.mxu1 %v1857_v34  ;;  %v1875_v34 = vpack.c.bf16 %v950_v27, %v946_v26  ;;  %v981_v25 = vld [vmem:[#allocation4 + $0x3a0] sm:$0xff]  ;;  %v983_v29 = vld [vmem:[#allocation4 + $0x3b0] sm:$0xff] }
  0x96   :  { %1860 = vmatprep.subr.bf16.mxu1 %v1859_v37  ;;  %v951_v37 = vld [vmem:[#allocation4 + $0x2b0] sm:$0xff] }
  0x97   :  { %1798 = vmatpush1.bf16.msra.mxu0 %v1797_v40  ;;  %v956_v40 = vld [vmem:[#allocation4 + $0x2d8] sm:$0xff] }
  0x98   :  { %1800 = vmatprep.subr.bf16.mxu0 %v1799_v43  ;;  %v1909_v43 = vpack.c.bf16 %v951_v37, %v947_v36  ;;  %v1911_v47 = vpack.c.bf16 %v960_v41, %v956_v40  ;;  %v1925_v36 = vpack.c.bf16 %v983_v29, %v979_v28  ;;  %v985_v37 = vld [vmem:[#allocation4 + $0x3c0] sm:$0xff]  ;;  %v1927_v40 = vpack.c.bf16 %v992_v33, %v988_v32  ;;  %v987_v41 = vld [vmem:[#allocation4 + $0x3d0] sm:$0xff]  ;;  %v827_v28 = vld [vmem:[#allocation2 + $0x4d8] sm:$0xff] }
  0x99   :  { %1862 = vmatpush1.bf16.msra.mxu1 %v1861_v46  ;;  %v1879_v46 = vpack.c.bf16 %v958_v39, %v954_v38  ;;  %v989_v38 = vld [vmem:[#allocation4 + $0x3e0] sm:$0xff]  ;;  %v831_v29 = vld [vmem:[#allocation2 + $0x4f8] sm:$0xff] }
  0x9a   :  { %1864 = vmatprep.subr.bf16.mxu1 %v1863_v49  ;;  %v959_v49 = vld [vmem:[#allocation4 + $0x2f0] sm:$0xff]  ;;  %v824_v32 = vld [vmem:[#allocation2 + $0x4c0] sm:$0xff] }
  0x9b   :  { %1802 = vmatpush1.bf16.msra.mxu0 %v1801_v52  ;;  %v964_v52 = vld [vmem:[#allocation4 + $0x318] sm:$0xff]  ;;  %v828_v33 = vld [vmem:[#allocation2 + $0x4e0] sm:$0xff] }
  0x9c   :  { %1868 = vmatprep.subr.bf16.mxu0 %v1867_v55  ;;  %v1913_v55 = vpack.c.bf16 %v959_v49, %v955_v48  ;;  %v1897_v48 = vpack.c.bf16 %v989_v38, %v985_v37  ;;  %v826_v37 = vld [vmem:[#allocation2 + $0x4d0] sm:$0xff] }
  0x9d   :  { %1866 = vmatpush1.bf16.msra.mxu1 %v1865_v56  ;;  %v961_v56 = vld [vmem:[#allocation4 + $0x300] sm:$0xff]  ;;  %v830_v38 = vld [vmem:[#allocation2 + $0x4f0] sm:$0xff] }
  0x9e   :  { %1900 = vmatprep.subr.bf16.mxu1 %v1899_v57  ;;  %v965_v57 = vld [vmem:[#allocation4 + $0x320] sm:$0xff] }
  0x9f   :  { %v1885_v8 = vpack.c.bf16 %v965_v57, %v961_v56  ;;  %v809_v56 = vld [vmem:[#allocation2 + $0x448] sm:$0xff] }
  0xa0   :  { %v813_v57 = vld [vmem:[#allocation2 + $0x468] sm:$0xff] }
 0x111   :  { %v193_v2 = vpop.f32.mrb[0].mxu0 }
 0x112   :  { %v194_v5 = vadd.f32 %v193_v2, %v93_v63  ;;  %v195_v6 = vpop.f32.mrb[1].mxu0  ;;  %v1883_v63 = vpack.c.bf16 %v966_v51, %v962_v50  ;;  %v963_v2 = vld [vmem:[#allocation4 + $0x310] sm:$0xff]  ;;  %v800_v50 = vld [vmem:[#allocation2 + $0x400] sm:$0xff] }
 0x113   :  { %v196_v10 = vadd.f32 %v195_v6, %v97_v1  ;;  %v2407_v14 = vpop.f32.mrb[0].mxu1  ;;  %v1915_v1 = vpack.c.bf16 %v968_v53, %v964_v52  ;;  %v972_v6 = vld [vmem:[#allocation4 + $0x358] sm:$0xff]  ;;  %v1917_v9 = vpack.c.bf16 %v967_v3, %v963_v2  ;;  %v804_v51 = vld [vmem:[#allocation2 + $0x420] sm:$0xff]  ;;  %v78_v3 = vld [vmem:[%s2486_s1 + $0x10] sm:$0xff] }
 0x114   :  { %v2409_v15 = vpop.f32.mrb[1].mxu1  ;;  %v269_v21 = vmax.f32 %v194_v5, 0.0  ;;  %v974_v5 = vld [vmem:[#allocation4 + $0x368] sm:$0xff]  ;;  %v1919_v13 = vpack.c.bf16 %v976_v7, %v972_v6  ;;  %v808_v6 = vld [vmem:[#allocation2 + $0x440] sm:$0xff] }
 0x115   :  { %v270_v16 = vmax.f32 %v196_v10, 0.0  ;;  %v969_v10 = vld [vmem:[#allocation4 + $0x340] sm:$0xff]  ;;  %v1887_v12 = vpack.c.bf16 %v974_v5, %v970_v4  ;;  %v1933_v4 = vpack.c.bf16 %v804_v51, %v800_v50  ;;  %v838_v50 = vld [vmem:[#allocation2 + $0x530] sm:$0xff]  ;;  %v841_v51 = vld [vmem:[#allocation2 + $0x548] sm:$0xff] }
 0x116   :  { %v812_v7 = vld [vmem:[#allocation2 + $0x460] sm:$0xff] }
 0x117   :  { %671 = vmatprep.mubr.f32.mxu0 %v270_v16  ;;  %742 = vmatprep.mubr.f32.mxu1 %v270_v16  ;;  %v971_v16 = vld [vmem:[#allocation4 + $0x350] sm:$0xff] }
 0x118   :  { %672 = vmatmul.mubr.f32.vlgmr.msra.gmra.mrb[2].mxu0 %v269_v21  ;;  %743 = vmatmul.mubr.f32.vlgmr.msra.gmra.mrb[2].mxu1 %v269_v21  ;;  %v984_v21 = vld [vmem:[#allocation4 + $0x3b8] sm:$0xff] }
 0x119   :  { %1870 = vmatpush1.bf16.msra.mxu0 %v1869_v17  ;;  %1902 = vmatpush1.bf16.msra.mxu1 %v1901_v18  ;;  %v975_v17 = vld [vmem:[#allocation4 + $0x370] sm:$0xff]  ;;  %v978_v18 = vld [vmem:[#allocation4 + $0x388] sm:$0xff]  ;;  %v1923_v27 = vpack.c.bf16 %v984_v21, %v980_v20  ;;  %v816_v20 = vld [vmem:[#allocation2 + $0x480] sm:$0xff] }
 0x11a   :  { %1872 = vmatprep.subr.bf16.mxu0 %v1871_v22  ;;  %1904 = vmatprep.subr.bf16.mxu1 %v1903_v23  ;;  %v1889_v22 = vpack.c.bf16 %v973_v11, %v969_v10  ;;  %v1921_v23 = vpack.c.bf16 %v975_v17, %v971_v16  ;;  %v1891_v26 = vpack.c.bf16 %v982_v19, %v978_v18  ;;  %v810_v10 = vld [vmem:[#allocation2 + $0x450] sm:$0xff]  ;;  %v819_v16 = vld [vmem:[#allocation2 + $0x498] sm:$0xff]  ;;  %v820_v21 = vld [vmem:[#allocation2 + $0x4a0] sm:$0xff] }
 0x11b   :  { %1057 = vmatprep.mubr.f32.mxu0 %v2239_v0  ;;  %1128 = vmatprep.mubr.f32.mxu1 %v2239_v0  ;;  %v814_v11 = vld [vmem:[#allocation2 + $0x470] sm:$0xff]  ;;  %v1937_v18 = vpack.c.bf16 %v812_v7, %v808_v6  ;;  %v853_v6 = vld [vmem:[#allocation2 + $0x5a8] sm:$0xff]  ;;  %v851_v7 = vld [vmem:[#allocation2 + $0x598] sm:$0xff] }
 0x11c   :  { %v2001_v19 = vpack.c.bf16 %v814_v11, %v810_v10  ;;  %v848_v11 = vld [vmem:[#allocation2 + $0x580] sm:$0xff] }
 0x11d   :  { %1874 = vmatpush1.bf16.msra.mxu0 %v1873_v30  ;;  %1906 = vmatpush1.bf16.msra.mxu1 %v1905_v31  ;;  %v986_v30 = vld [vmem:[#allocation4 + $0x3c8] sm:$0xff] }
 0x11e   :  { %1876 = vmatprep.subr.bf16.mxu0 %v1875_v34  ;;  %1908 = vmatprep.subr.bf16.mxu1 %v1907_v35  ;;  %v990_v31 = vld [vmem:[#allocation4 + $0x3e8] sm:$0xff]  ;;  %v2414_v34 = vsub.s32 3, %v2390_v59  ;;  %v1893_v35 = vpack.c.bf16 %v981_v25, %v977_v24  ;;  %v818_v24 = vld [vmem:[#allocation2 + $0x490] sm:$0xff] }
 0x11f   :  { %v1895_v39 = vpack.c.bf16 %v990_v31, %v986_v30  ;;  %v822_v25 = vld [vmem:[#allocation2 + $0x4b0] sm:$0xff]  ;;  %v1941_v30 = vpack.c.bf16 %v820_v21, %v816_v20  ;;  %v859_v20 = vld [vmem:[#allocation2 + $0x5d8] sm:$0xff] }
 0x120   :  { %v2005_v31 = vpack.c.bf16 %v822_v25, %v818_v24  ;;  %v863_v21 = vld [vmem:[#allocation2 + $0x5f8] sm:$0xff]  ;;  %v856_v24 = vld [vmem:[#allocation2 + $0x5c0] sm:$0xff] }
 0x121   :  { %1878 = vmatpush1.bf16.msra.mxu0 %v1877_v42  ;;  %1910 = vmatpush1.bf16.msra.mxu1 %v1909_v43  ;;  %v991_v42 = vld [vmem:[#allocation4 + $0x3f0] sm:$0xff]  ;;  %v801_v43 = vld [vmem:[#allocation2 + $0x408] sm:$0xff]  ;;  %v860_v25 = vld [vmem:[#allocation2 + $0x5e0] sm:$0xff] }
 0x122   :  { %1880 = vmatprep.subr.bf16.mxu0 %v1879_v46  ;;  %1912 = vmatprep.subr.bf16.mxu1 %v1911_v47  ;;  %v807_v46 = vld [vmem:[#allocation2 + $0x438] sm:$0xff]  ;;  %v105_v47 = vrot.slane %v2398_v61, %v2414_v34  ;;  %v1929_v49 = vpack.c.bf16 %v991_v42, %v987_v41  ;;  %v1931_v52 = vpack.c.bf16 %v805_v44, %v801_v43 }
 0x123   :  { %v1995_v53 = vpack.c.bf16 %v807_v46, %v803_v45  ;;  %v835_v41 = vld [vmem:[#allocation2 + $0x518] sm:$0xff]  ;;  %v1945_v43 = vpack.c.bf16 %v828_v33, %v824_v32  ;;  %v2009_v44 = vpack.c.bf16 %v830_v38, %v826_v37  ;;  %v832_v45 = vld [vmem:[#allocation2 + $0x500] sm:$0xff] }
 0x124   :  { %v267_v2 = vadd.f32 %v2409_v15, %v105_v47  ;;  %v823_v15 = vld [vmem:[#allocation2 + $0x4b8] sm:$0xff]  ;;  %v836_v46 = vld [vmem:[#allocation2 + $0x520] sm:$0xff] }
 0x125   :  { %1882 = vmatpush1.bf16.msra.mxu0 %v1881_v54  ;;  %1914 = vmatpush1.bf16.msra.mxu1 %v1913_v55  ;;  %v802_v54 = vld [vmem:[#allocation2 + $0x410] sm:$0xff]  ;;  %v839_v42 = vld [vmem:[#allocation2 + $0x538] sm:$0xff]  ;;  %v864_v37 = vld [vmem:[#allocation2 + $0x600] sm:$0xff] }
 0x126   :  { %1884 = vmatprep.subr.bf16.mxu0 %v1883_v63  ;;  %1916 = vmatprep.subr.bf16.mxu1 %v1915_v1  ;;  %v806_v55 = vld [vmem:[#allocation2 + $0x430] sm:$0xff]  ;;  %v811_v63 = vld [vmem:[#allocation2 + $0x458] sm:$0xff]  ;;  %v272_v17 = vmax.f32 %v267_v2, 0.0  ;;  %v868_v38 = vld [vmem:[#allocation2 + $0x620] sm:$0xff] }
 0x127   :  { %v815_v1 = vld [vmem:[#allocation2 + $0x478] sm:$0xff]  ;;  %v1997_v5 = vpack.c.bf16 %v806_v55, %v802_v54  ;;  %v1949_v55 = vpack.c.bf16 %v836_v46, %v832_v45 }
 0x128   :  { %v847_v54 = vld [vmem:[#allocation2 + $0x578] sm:$0xff] }
 0x129   :  { %1886 = vmatpush1.bf16.msra.mxu0 %v1885_v8  ;;  %1918 = vmatpush1.bf16.msra.mxu1 %v1917_v9  ;;  %v1935_v8 = vpack.c.bf16 %v813_v57, %v809_v56  ;;  %v1999_v9 = vpack.c.bf16 %v815_v1, %v811_v63  ;;  %v840_v57 = vld [vmem:[#allocation2 + $0x540] sm:$0xff]  ;;  %v867_v32 = vld [vmem:[#allocation2 + $0x618] sm:$0xff] }
 0x12a   :  { %1888 = vmatprep.subr.bf16.mxu0 %v1887_v12  ;;  %1920 = vmatprep.subr.bf16.mxu1 %v1919_v13  ;;  %v817_v12 = vld [vmem:[#allocation2 + $0x488] sm:$0xff]  ;;  %v844_v63 = vld [vmem:[#allocation2 + $0x560] sm:$0xff]  ;;  %v871_v33 = vld [vmem:[#allocation2 + $0x638] sm:$0xff] }
 0x12b   :  { %v821_v13 = vld [vmem:[#allocation2 + $0x4a8] sm:$0xff]  ;;  %v875_v45 = vld [vmem:[#allocation2 + $0x658] sm:$0xff] }
 0x12c   :  { %v879_v46 = vld [vmem:[#allocation2 + $0x678] sm:$0xff] }
 0x12d   :  { %1890 = vmatpush1.bf16.msra.mxu0 %v1889_v22  ;;  %1922 = vmatpush1.bf16.msra.mxu1 %v1921_v23  ;;  %v1939_v22 = vpack.c.bf16 %v821_v13, %v817_v12  ;;  %v2003_v23 = vpack.c.bf16 %v823_v15, %v819_v16  ;;  %v852_v12 = vld [vmem:[#allocation2 + $0x5a0] sm:$0xff]  ;;  %v850_v15 = vld [vmem:[#allocation2 + $0x590] sm:$0xff] }
 0x12e   :  { %1892 = vmatprep.subr.bf16.mxu0 %v1891_v26  ;;  %1924 = vmatprep.subr.bf16.mxu1 %v1923_v27  ;;  %v825_v26 = vld [vmem:[#allocation2 + $0x4c8] sm:$0xff] }
 0x12f   :  { %v829_v27 = vld [vmem:[#allocation2 + $0x4e8] sm:$0xff] }
 0x131   :  { %1894 = vmatpush1.bf16.msra.mxu0 %v1893_v35  ;;  %1926 = vmatpush1.bf16.msra.mxu1 %v1925_v36  ;;  %v1943_v35 = vpack.c.bf16 %v829_v27, %v825_v26  ;;  %v2007_v36 = vpack.c.bf16 %v831_v29, %v827_v28  ;;  %v2023_v27 = vpack.c.bf16 %v863_v21, %v859_v20  ;;  %v858_v28 = vld [vmem:[#allocation2 + $0x5d0] sm:$0xff] }
 0x132   :  { %1896 = vmatprep.subr.bf16.mxu0 %v1895_v39  ;;  %1928 = vmatprep.subr.bf16.mxu1 %v1927_v40  ;;  %v833_v39 = vld [vmem:[#allocation2 + $0x508] sm:$0xff]  ;;  %v862_v29 = vld [vmem:[#allocation2 + $0x5f0] sm:$0xff] }
 0x133   :  { %v837_v40 = vld [vmem:[#allocation2 + $0x528] sm:$0xff]  ;;  %v890_v20 = vld [vmem:[#allocation2 + $0x6d0] sm:$0xff] }
 0x134   :  { %v1947_v47 = vpack.c.bf16 %v837_v40, %v833_v39  ;;  %v2027_v40 = vpack.c.bf16 %v871_v33, %v867_v32  ;;  %v894_v21 = vld [vmem:[#allocation2 + $0x6f0] sm:$0xff] }
 0x135   :  { %1898 = vmatpush1.bf16.msra.mxu0 %v1897_v48  ;;  %1930 = vmatpush1.bf16.msra.mxu1 %v1929_v49  ;;  %v2011_v48 = vpack.c.bf16 %v839_v42, %v835_v41  ;;  %v834_v49 = vld [vmem:[#allocation2 + $0x510] sm:$0xff] }
 0x136   :  { %1932 = vmatprep.subr.bf16.mxu0 %v1931_v52  ;;  %1996 = vmatprep.subr.bf16.mxu1 %v1995_v53  ;;  %v845_v52 = vld [vmem:[#allocation2 + $0x568] sm:$0xff]  ;;  %v843_v53 = vld [vmem:[#allocation2 + $0x558] sm:$0xff]  ;;  %v2013_v56 = vpack.c.bf16 %v838_v50, %v834_v49  ;;  %v866_v41 = vld [vmem:[#allocation2 + $0x610] sm:$0xff] }
 0x137   :  { %v1951_v1 = vpack.c.bf16 %v845_v52, %v841_v51  ;;  %v2015_v2 = vpack.c.bf16 %v847_v54, %v843_v53  ;;  %v870_v42 = vld [vmem:[#allocation2 + $0x630] sm:$0xff]  ;;  %v872_v49 = vld [vmem:[#allocation2 + $0x640] sm:$0xff]  ;;  %v2031_v52 = vpack.c.bf16 %v879_v46, %v875_v45 }
 0x138   :  { %1058 = vmatmul.mubr.f32.vlgmr.msra.gmra.mrb[4].mxu0 %v78_v3  ;;  %1129 = vmatmul.mubr.f32.vlgmr.msra.gmra.mrb[4].mxu1 %v78_v3  ;;  %v842_v3 = vld [vmem:[#allocation2 + $0x550] sm:$0xff]  ;;  %v876_v50 = vld [vmem:[#allocation2 + $0x660] sm:$0xff] }
 0x139   :  { %1934 = vmatpush1.bf16.msra.mxu0 %v1933_v4  ;;  %1998 = vmatpush1.bf16.msra.mxu1 %v1997_v5  ;;  %v846_v4 = vld [vmem:[#allocation2 + $0x570] sm:$0xff]  ;;  %v849_v5 = vld [vmem:[#allocation2 + $0x588] sm:$0xff] }
 0x13a   :  { %1936 = vmatprep.subr.bf16.mxu0 %v1935_v8  ;;  %2000 = vmatprep.subr.bf16.mxu1 %v1999_v9  ;;  %v855_v8 = vld [vmem:[#allocation2 + $0x5b8] sm:$0xff]  ;;  %v1953_v9 = vpack.c.bf16 %v844_v63, %v840_v57  ;;  %v2017_v10 = vpack.c.bf16 %v846_v4, %v842_v3  ;;  %v1955_v13 = vpack.c.bf16 %v853_v6, %v849_v5  ;;  %v874_v53 = vld [vmem:[#allocation2 + $0x650] sm:$0xff]  ;;  %v880_v3 = vld [vmem:[#allocation2 + $0x680] sm:$0xff] }
 0x13b   :  { %1199 = vmatprep.mubr.f32.mxu0 %v272_v17  ;;  %1270 = vmatprep.mubr.f32.mxu1 %v272_v17  ;;  %v2019_v16 = vpack.c.bf16 %v855_v8, %v851_v7  ;;  %v854_v17 = vld [vmem:[#allocation2 + $0x5b0] sm:$0xff]  ;;  %v883_v57 = vld [vmem:[#allocation2 + $0x698] sm:$0xff]  ;;  %v884_v4 = vld [vmem:[#allocation2 + $0x6a0] sm:$0xff] }
 0x13c   :  { %v878_v54 = vld [vmem:[#allocation2 + $0x670] sm:$0xff]  ;;  %v887_v63 = vld [vmem:[#allocation2 + $0x6b8] sm:$0xff] }
 0x13d   :  { %1938 = vmatpush1.bf16.msra.mxu0 %v1937_v18  ;;  %2002 = vmatpush1.bf16.msra.mxu1 %v2001_v19  ;;  %v857_v18 = vld [vmem:[#allocation2 + $0x5c8] sm:$0xff]  ;;  %v2035_v6 = vpack.c.bf16 %v887_v63, %v883_v57  ;;  %v882_v7 = vld [vmem:[#allocation2 + $0x690] sm:$0xff] }
 0x13e   :  { %1940 = vmatprep.subr.bf16.mxu0 %v1939_v22  ;;  %2004 = vmatprep.subr.bf16.mxu1 %v2003_v23  ;;  %v861_v19 = vld [vmem:[#allocation2 + $0x5e8] sm:$0xff]  ;;  %v1957_v22 = vpack.c.bf16 %v852_v12, %v848_v11  ;;  %v2021_v23 = vpack.c.bf16 %v854_v17, %v850_v15  ;;  %v886_v8 = vld [vmem:[#allocation2 + $0x6b0] sm:$0xff]  ;;  %v891_v11 = vld [vmem:[#allocation2 + $0x6d8] sm:$0xff] }
 0x13f   :  { %v1959_v26 = vpack.c.bf16 %v861_v19, %v857_v18  ;;  %v895_v12 = vld [vmem:[#allocation2 + $0x6f8] sm:$0xff]  ;;  %v888_v15 = vld [vmem:[#allocation2 + $0x6c0] sm:$0xff]  ;;  %v898_v32 = vld [vmem:[#allocation2 + $0x710] sm:$0xff] }
 0x140   :  { %v892_v17 = vld [vmem:[#allocation2 + $0x6e0] sm:$0xff]  ;;  %v2039_v19 = vpack.c.bf16 %v895_v12, %v891_v11  ;;  %v902_v33 = vld [vmem:[#allocation2 + $0x730] sm:$0xff] }
 0x141   :  { %1942 = vmatpush1.bf16.msra.mxu0 %v1941_v30  ;;  %2006 = vmatpush1.bf16.msra.mxu1 %v2005_v31  ;;  %v865_v30 = vld [vmem:[#allocation2 + $0x608] sm:$0xff]  ;;  %v906_v45 = vld [vmem:[#allocation2 + $0x750] sm:$0xff]  ;;  %v924_v11 = vld [vmem:[#allocation2 + $0x7e0] sm:$0xff] }
 0x142   :  { %1944 = vmatprep.subr.bf16.mxu0 %v1943_v35  ;;  %2008 = vmatprep.subr.bf16.mxu1 %v2007_v36  ;;  %v869_v31 = vld [vmem:[#allocation2 + $0x628] sm:$0xff]  ;;  %v1961_v35 = vpack.c.bf16 %v860_v25, %v856_v24  ;;  %v2025_v36 = vpack.c.bf16 %v862_v29, %v858_v28  ;;  %v899_v24 = vld [vmem:[#allocation2 + $0x718] sm:$0xff]  ;;  %v896_v28 = vld [vmem:[#allocation2 + $0x700] sm:$0xff] }
 0x143   :  { %v1963_v39 = vpack.c.bf16 %v869_v31, %v865_v30  ;;  %v903_v25 = vld [vmem:[#allocation2 + $0x738] sm:$0xff]  ;;  %v900_v29 = vld [vmem:[#allocation2 + $0x720] sm:$0xff]  ;;  %v910_v46 = vld [vmem:[#allocation2 + $0x770] sm:$0xff] }
 0x144   :  { %v2043_v31 = vpack.c.bf16 %v903_v25, %v899_v24  ;;  %v914_v63 = vld [vmem:[#allocation2 + $0x790] sm:$0xff]  ;;  %v1331_v24 = vld [vmem:[#allocation6 + $0x20] sm:$0xff]  ;;  %v1332_v25 = vld [vmem:[#allocation6 + $0x28] sm:$0xff] }
 0x145   :  { %1946 = vmatpush1.bf16.msra.mxu0 %v1945_v43  ;;  %2010 = vmatpush1.bf16.msra.mxu1 %v2009_v44  ;;  %v873_v43 = vld [vmem:[#allocation2 + $0x648] sm:$0xff]  ;;  %v922_v12 = vld [vmem:[#allocation2 + $0x7d0] sm:$0xff] }
 0x146   :  { %1948 = vmatprep.subr.bf16.mxu0 %v1947_v47  ;;  %2012 = vmatprep.subr.bf16.mxu1 %v2011_v48  ;;  %v877_v44 = vld [vmem:[#allocation2 + $0x668] sm:$0xff]  ;;  %v1965_v47 = vpack.c.bf16 %v868_v38, %v864_v37  ;;  %v2029_v48 = vpack.c.bf16 %v870_v42, %v866_v41  ;;  %v907_v37 = vld [vmem:[#allocation2 + $0x758] sm:$0xff]  ;;  %v904_v41 = vld [vmem:[#allocation2 + $0x740] sm:$0xff] }
 0x147   :  { %v1967_v51 = vpack.c.bf16 %v877_v44, %v873_v43  ;;  %v911_v38 = vld [vmem:[#allocation2 + $0x778] sm:$0xff]  ;;  %v908_v42 = vld [vmem:[#allocation2 + $0x760] sm:$0xff] }
 0x148   :  { %v2047_v44 = vpack.c.bf16 %v911_v38, %v907_v37  ;;  %v1340_v38 = vld [vmem:[#allocation6 + $0x68] sm:$0xff] }
 0x149   :  { %1950 = vmatpush1.bf16.msra.mxu0 %v1949_v55  ;;  %2014 = vmatpush1.bf16.msra.mxu1 %v2013_v56  ;;  %v881_v55 = vld [vmem:[#allocation2 + $0x688] sm:$0xff] }
 0x14a   :  { %1952 = vmatprep.subr.bf16.mxu0 %v1951_v1  ;;  %2016 = vmatprep.subr.bf16.mxu1 %v2015_v2  ;;  %v885_v56 = vld [vmem:[#allocation2 + $0x6a8] sm:$0xff]  ;;  %v1969_v1 = vpack.c.bf16 %v876_v50, %v872_v49  ;;  %v2033_v2 = vpack.c.bf16 %v878_v54, %v874_v53  ;;  %v915_v49 = vld [vmem:[#allocation2 + $0x798] sm:$0xff]  ;;  %v912_v53 = vld [vmem:[#allocation2 + $0x780] sm:$0xff] }
 0x14b   :  { %v1971_v5 = vpack.c.bf16 %v885_v56, %v881_v55  ;;  %v919_v50 = vld [vmem:[#allocation2 + $0x7b8] sm:$0xff]  ;;  %v916_v54 = vld [vmem:[#allocation2 + $0x7a0] sm:$0xff]  ;;  %v2423_v55 = vsub.s32 2, %v2390_v59 }
 0x14c   :  { %v2051_v57 = vpack.c.bf16 %v919_v50, %v915_v49  ;;  %v1348_v49 = vld [vmem:[#allocation6 + $0xa8] sm:$0xff] }
 0x14d   :  { %1954 = vmatpush1.bf16.msra.mxu0 %v1953_v9  ;;  %2018 = vmatpush1.bf16.msra.mxu1 %v2017_v10  ;;  %v889_v9 = vld [vmem:[#allocation2 + $0x6c8] sm:$0xff] }
 0x14e   :  { %1956 = vmatprep.subr.bf16.mxu0 %v1955_v13  ;;  %2020 = vmatprep.subr.bf16.mxu1 %v2019_v16  ;;  %v893_v10 = vld [vmem:[#allocation2 + $0x6e8] sm:$0xff]  ;;  %v1973_v13 = vpack.c.bf16 %v884_v4, %v880_v3  ;;  %v2037_v16 = vpack.c.bf16 %v886_v8, %v882_v7  ;;  %v923_v4 = vld [vmem:[#allocation2 + $0x7d8] sm:$0xff]  ;;  %v920_v8 = vld [vmem:[#allocation2 + $0x7c0] sm:$0xff] }
 0x14f   :  { %v1975_v18 = vpack.c.bf16 %v893_v10, %v889_v9  ;;  %v925_v3 = vld [vmem:[#allocation2 + $0x7e8] sm:$0xff]  ;;  %v101_v9 = vrot.slane %v2398_v61, %v2423_v55  ;;  %v1327_v61 = vld [vmem:[#allocation6] sm:$0xff] }
 0x151   :  { %1958 = vmatpush1.bf16.msra.mxu0 %v1957_v22  ;;  %2022 = vmatpush1.bf16.msra.mxu1 %v2021_v23  ;;  %v897_v22 = vld [vmem:[#allocation2 + $0x708] sm:$0xff] }
 0x152   :  { %1960 = vmatprep.subr.bf16.mxu0 %v1959_v26  ;;  %2024 = vmatprep.subr.bf16.mxu1 %v2023_v27  ;;  %v901_v23 = vld [vmem:[#allocation2 + $0x728] sm:$0xff]  ;;  %v1977_v26 = vpack.c.bf16 %v892_v17, %v888_v15  ;;  %v2041_v27 = vpack.c.bf16 %v894_v21, %v890_v20  ;;  %v265_v17 = vadd.f32 %v2407_v14, %v101_v9  ;;  %v2241_v21 = vmov 0.0|0.0   ;;  %v1330_v14 = vld [vmem:[#allocation6 + $0x18] sm:$0xff]  ;;  %v1353_v9 = vld [vmem:[#allocation6 + $0xd0] sm:$0xff] }
 0x153   :  { %v1979_v30 = vpack.c.bf16 %v901_v23, %v897_v22  ;;  %v1329_v22 = vld [vmem:[#allocation6 + $0x10] sm:$0xff] }
 0x154   :  { %v2087_v23 = vpack.c.bf16 %v1330_v14, %v1329_v22 }
 0x155   :  { %1962 = vmatpush1.bf16.msra.mxu0 %v1961_v35  ;;  %2026 = vmatpush1.bf16.msra.mxu1 %v2025_v36  ;;  %v905_v35 = vld [vmem:[#allocation2 + $0x748] sm:$0xff] }
 0x156   :  { %1964 = vmatprep.subr.bf16.mxu0 %v1963_v39  ;;  %2028 = vmatprep.subr.bf16.mxu1 %v2027_v40  ;;  %v909_v36 = vld [vmem:[#allocation2 + $0x768] sm:$0xff]  ;;  %v1981_v39 = vpack.c.bf16 %v900_v29, %v896_v28  ;;  %v2045_v40 = vpack.c.bf16 %v902_v33, %v898_v32  ;;  %v1334_v28 = vld [vmem:[#allocation6 + $0x38] sm:$0xff]  ;;  %v1337_v33 = vld [vmem:[#allocation6 + $0x50] sm:$0xff] }
 0x157   :  { %v1983_v43 = vpack.c.bf16 %v909_v36, %v905_v35  ;;  %v1338_v35 = vld [vmem:[#allocation6 + $0x58] sm:$0xff]  ;;  %v1339_v36 = vld [vmem:[#allocation6 + $0x60] sm:$0xff] }
 0x158   :  { %v2099_v37 = vpack.c.bf16 %v1338_v35, %v1337_v33 }
 0x159   :  { %1966 = vmatpush1.bf16.msra.mxu0 %v1965_v47  ;;  %2030 = vmatpush1.bf16.msra.mxu1 %v2029_v48  ;;  %v913_v47 = vld [vmem:[#allocation2 + $0x788] sm:$0xff] }
 0x15a   :  { %1968 = vmatprep.subr.bf16.mxu0 %v1967_v51  ;;  %2032 = vmatprep.subr.bf16.mxu1 %v2031_v52  ;;  %v917_v48 = vld [vmem:[#allocation2 + $0x7a8] sm:$0xff]  ;;  %v1985_v51 = vpack.c.bf16 %v908_v42, %v904_v41  ;;  %v2049_v52 = vpack.c.bf16 %v910_v46, %v906_v45  ;;  %v1342_v41 = vld [vmem:[#allocation6 + $0x78] sm:$0xff]  ;;  %v1345_v46 = vld [vmem:[#allocation6 + $0x90] sm:$0xff] }
 0x15b   :  { %v1987_v56 = vpack.c.bf16 %v917_v48, %v913_v47  ;;  %v1346_v47 = vld [vmem:[#allocation6 + $0x98] sm:$0xff]  ;;  %v1347_v48 = vld [vmem:[#allocation6 + $0xa0] sm:$0xff] }
 0x15c   :  { %v2066_v50 = vpack.c.bf16 %v1348_v49, %v1347_v48 }
 0x15d   :  { %1970 = vmatpush1.bf16.msra.mxu0 %v1969_v1  ;;  %2034 = vmatpush1.bf16.msra.mxu1 %v2033_v2  ;;  %v918_v1 = vld [vmem:[#allocation2 + $0x7b0] sm:$0xff]  ;;  %v921_v2 = vld [vmem:[#allocation2 + $0x7c8] sm:$0xff] }
 0x15e   :  { %1972 = vmatprep.subr.bf16.mxu0 %v1971_v5  ;;  %2036 = vmatprep.subr.bf16.mxu1 %v2035_v6  ;;  %v927_v5 = vld [vmem:[#allocation2 + $0x7f8] sm:$0xff]  ;;  %v1989_v6 = vpack.c.bf16 %v916_v54, %v912_v53  ;;  %v2053_v7 = vpack.c.bf16 %v918_v1, %v914_v63  ;;  %v1991_v59 = vpack.c.bf16 %v925_v3, %v921_v2  ;;  %v1351_v63 = vld [vmem:[#allocation6 + $0xc0] sm:$0xff]  ;;  %v1352_v1 = vld [vmem:[#allocation6 + $0xc8] sm:$0xff] }
 0x15f   :  { %v2055_v10 = vpack.c.bf16 %v927_v5, %v923_v4  ;;  %v1350_v53 = vld [vmem:[#allocation6 + $0xb8] sm:$0xff]  ;;  %v2072_v2 = vpack.c.bf16 %v1352_v1, %v1351_v63 }
 0x161   :  { %1974 = vmatpush1.bf16.msra.mxu0 %v1973_v13  ;;  %2038 = vmatpush1.bf16.msra.mxu1 %v2037_v16  ;;  %v926_v13 = vld [vmem:[#allocation2 + $0x7f0] sm:$0xff]  ;;  %v1993_v16 = vpack.c.bf16 %v924_v11, %v920_v8 }
 0x162   :  { %1976 = vmatprep.subr.bf16.mxu0 %v1975_v18  ;;  %2040 = vmatprep.subr.bf16.mxu1 %v2039_v19  ;;  %v2057_v15 = vpack.c.bf16 %v926_v13, %v922_v12  ;;  %v271_v18 = vmax.f32 %v265_v17, 0.0  ;;  %v1328_v19 = vld [vmem:[#allocation6 + $0x8] sm:$0xff] }
 0x163   :  { %v2084_v20 = vpack.c.bf16 %v1328_v19, %v1327_v61  ;;  %v1356_v13 = vld [vmem:[#allocation6 + $0xe8] sm:$0xff]  ;;  %v1358_v61 = vld [vmem:[#allocation6 + $0xf8] sm:$0xff] }
 0x165   :  { %1978 = vmatpush1.bf16.msra.mxu0 %v1977_v26  ;;  %2042 = vmatpush1.bf16.msra.mxu1 %v2041_v27  ;;  %v2090_v26 = vpack.c.bf16 %v1332_v25, %v1331_v24  ;;  %v1333_v27 = vld [vmem:[#allocation6 + $0x30] sm:$0xff] }
 0x166   :  { %1980 = vmatprep.subr.bf16.mxu0 %v1979_v30  ;;  %2044 = vmatprep.subr.bf16.mxu1 %v2043_v31  ;;  %v2093_v29 = vpack.c.bf16 %v1334_v28, %v1333_v27  ;;  %v1335_v30 = vld [vmem:[#allocation6 + $0x40] sm:$0xff]  ;;  %v1336_v31 = vld [vmem:[#allocation6 + $0x48] sm:$0xff] }
 0x167   :  { %v2096_v32 = vpack.c.bf16 %v1336_v31, %v1335_v30  ;;  %v77_v30 = vld [vmem:[%s2486_s1 + $0x8] sm:$0xff] }
 0x169   :  { %1982 = vmatpush1.bf16.msra.mxu0 %v1981_v39  ;;  %2046 = vmatpush1.bf16.msra.mxu1 %v2045_v40  ;;  %v2102_v39 = vpack.c.bf16 %v1340_v38, %v1339_v36  ;;  %v1341_v40 = vld [vmem:[#allocation6 + $0x70] sm:$0xff] }
 0x16a   :  { %1984 = vmatprep.subr.bf16.mxu0 %v1983_v43  ;;  %2048 = vmatprep.subr.bf16.mxu1 %v2047_v44  ;;  %v2105_v42 = vpack.c.bf16 %v1342_v41, %v1341_v40  ;;  %v1343_v43 = vld [vmem:[#allocation6 + $0x80] sm:$0xff]  ;;  %v1344_v44 = vld [vmem:[#allocation6 + $0x88] sm:$0xff] }
 0x16b   :  { %v2060_v45 = vpack.c.bf16 %v1344_v44, %v1343_v43  ;;  %v1277_v40 = vld [vmem:[%s2491_s6 + $0x4] sm:$0xf] }
 0x16c   :  { %v1282_v41 = vrot.slane %v1277_v40, %v2393_v60 }
 0x16d   :  { %1986 = vmatpush1.bf16.msra.mxu0 %v1985_v51  ;;  %2050 = vmatpush1.bf16.msra.mxu1 %v2049_v52  ;;  %v749_v51 = vld [vmem:[%s2491_s6] sm:$0xf]  ;;  %v1349_v52 = vld [vmem:[#allocation6 + $0xb0] sm:$0xff] }
 0x16e   :  { %1988 = vmatprep.subr.bf16.mxu0 %v1987_v56  ;;  %2052 = vmatprep.subr.bf16.mxu1 %v2051_v57  ;;  %v2069_v54 = vpack.c.bf16 %v1350_v53, %v1349_v52  ;;  %v754_v56 = vrot.slane %v749_v51, %v2393_v60  ;;  %v758_v57 = vrot.slane %v749_v51, %v2401_v62 }
 0x16f   :  { %v1290_v52 = vrot.slane %v1277_v40, %v2423_v55 }
 0x171   :  { %1990 = vmatpush1.bf16.msra.mxu0 %v1989_v6  ;;  %2054 = vmatpush1.bf16.msra.mxu1 %v2053_v7 }
 0x172   :  { %1992 = vmatprep.subr.bf16.mxu0 %v1991_v59  ;;  %2056 = vmatprep.subr.bf16.mxu1 %v2055_v10  ;;  %v1354_v59 = vld [vmem:[#allocation6 + $0xd8] sm:$0xff]  ;;  %v1355_v10 = vld [vmem:[#allocation6 + $0xe0] sm:$0xff] }
 0x173   :  { %v2075_v12 = vpack.c.bf16 %v1354_v59, %v1353_v9  ;;  %v2078_v17 = vpack.c.bf16 %v1356_v13, %v1355_v10 }
 0x175   :  { %1994 = vmatpush1.bf16.msra.mxu0 %v1993_v16  ;;  %2058 = vmatpush1.bf16.msra.mxu1 %v2057_v15  ;;  %v766_v15 = vrot.slane %v749_v51, %v2414_v34 }
 0x176   :  { %2083 = vmatprep.subr.bf16.mxu1 %v2241_v21  ;;  %2059 = vmatprep.subr.bf16.mxu0 %v2241_v21 }
 0x178   :  { %1200 = vmatmul.mubr.f32.vlgmr.msra.gmra.mrb[4].mxu0 %v271_v18  ;;  %1271 = vmatmul.mubr.f32.vlgmr.msra.gmra.mrb[4].mxu1 %v271_v18  ;;  %v1357_v18 = vld [vmem:[#allocation6 + $0xf0] sm:$0xff] }
 0x179   :  { %2085 = vmatpush3.bf16.msra.mxu1 %v2084_v20  ;;  %1660 = vmatprep.mubr.msk.f32.mxu1 %vm2242_vm4, %v2239_v0  ;;  %v762_v20 = vrot.slane %v749_v51, %v2423_v55  ;;  %v2081_v22 = vpack.c.bf16 %v1358_v61, %v1357_v18 }
 0x17a   :  { %2086 = vmatprep.subr.bf16.mxu1 %v2241_v21  ;;  %1625 = vmatprep.mubr.msk.f32.mxu0 %vm2242_vm4, %v2239_v0  ;;  %v2063_v0 = vpack.c.bf16 %v1346_v47, %v1345_v46 }
 0x17b   :  { %2061 = vmatpush3.bf16.msra.mxu0 %v2060_v45 }
 0x17c   :  { %2062 = vmatprep.subr.bf16.mxu0 %v2241_v21 }
 0x17d   :  { %2088 = vmatpush3.bf16.msra.mxu1 %v2087_v23 }
 0x17e   :  { %2089 = vmatprep.subr.bf16.mxu1 %v2241_v21 }
 0x17f   :  { %2064 = vmatpush3.bf16.msra.mxu0 %v2063_v0 }
 0x180   :  { %2065 = vmatprep.subr.bf16.mxu0 %v2241_v21 }
 0x181   :  { %2091 = vmatpush3.bf16.msra.mxu1 %v2090_v26 }
 0x182   :  { %2092 = vmatprep.subr.bf16.mxu1 %v2241_v21 }
 0x183   :  { %2067 = vmatpush3.bf16.msra.mxu0 %v2066_v50  ;;  %v1294_v50 = vrot.slane %v1277_v40, %v2414_v34 }
 0x184   :  { %2068 = vmatprep.subr.bf16.mxu0 %v2241_v21 }
 0x185   :  { %2094 = vmatpush3.bf16.msra.mxu1 %v2093_v29 }
 0x186   :  { %2095 = vmatprep.subr.bf16.mxu1 %v2241_v21 }
 0x187   :  { %2070 = vmatpush3.bf16.msra.mxu0 %v2069_v54 }
 0x188   :  { %2071 = vmatprep.subr.bf16.mxu0 %v2241_v21 }
 0x189   :  { %2097 = vmatpush3.bf16.msra.mxu1 %v2096_v32 }
 0x18a   :  { %2098 = vmatprep.subr.bf16.mxu1 %v2241_v21 }
 0x18b   :  { %2073 = vmatpush3.bf16.msra.mxu0 %v2072_v2 }
 0x18c   :  { %2074 = vmatprep.subr.bf16.mxu0 %v2241_v21 }
 0x18d   :  { %2100 = vmatpush3.bf16.msra.mxu1 %v2099_v37 }
 0x18e   :  { %2101 = vmatprep.subr.bf16.mxu1 %v2241_v21 }
 0x18f   :  { %2076 = vmatpush3.bf16.msra.mxu0 %v2075_v12  ;;  %v1558_v12 = vld [vmem:[%s2493_s8] ss:$0 sm:$0xff] }
 0x190   :  { %2077 = vmatprep.subr.bf16.mxu0 %v2241_v21 }
 0x191   :  { %2103 = vmatpush3.bf16.msra.mxu1 %v2102_v39 }
 0x192   :  { %2104 = vmatprep.subr.bf16.mxu1 %v2241_v21 }
 0x193   :  { %2079 = vmatpush3.bf16.msra.mxu0 %v2078_v17 }
 0x194   :  { %2080 = vmatprep.subr.bf16.mxu0 %v2241_v21 }
 0x195   :  { %2106 = vmatpush3.bf16.msra.mxu1 %v2105_v42  ;;  %v1286_v42 = vrot.slane %v1277_v40, %v2401_v62 }
 0x197   :  { %2082 = vmatpush3.bf16.msra.mxu0 %v2081_v22 }
 0x1eb   :  { %v673_v3 = vpop.f32.mrb[2].mxu0  ;;  %v744_v4 = vpop.f32.mrb[2].mxu1 }
 0x1ec   :  { %v771_v5 = vadd.f32 %v754_v56, %v673_v3  ;;  %v675_v6 = vpop.f32.mrb[3].mxu0  ;;  %v746_v7 = vpop.f32.mrb[3].mxu1  ;;  %v773_v23 = vadd.f32 %v762_v20, %v744_v4 }
 0x1ed   :  { %v772_v8 = vadd.f32 %v758_v57, %v675_v6  ;;  %v774_v19 = vadd.f32 %v766_v15, %v746_v7 }
 0x1ee   :  { %v1552_v11 = vmul.f32 -1.442695, %v771_v5 }
 0x1ef   :  { %v1553_v16 = vmul.f32 -1.442695, %v772_v8  ;;  %v1554_v14 = vmul.f32 -1.442695, %v774_v19 }
 0x1f0   :  { %2126 = vpow2.f32 %v1552_v11 }
 0x1f1   :  { %2128 = vpow2.f32 %v1553_v16 }
 0x1f2   :  { %2130 = vpow2.f32 %v1554_v14  ;;  %v1508_v14 = vand.u32 127, %v90_v58 }
 0x1f3   :  { %2132 = vtanh.f32 %v773_v23 }
 0x1f4   :  { %vm1509_vm5 = vcmp.ge.s32.totalorder %v1508_v14, 3  ;;  %vm1510_vm6 = vcmp.lt.s32.totalorder %v1508_v14, 6 }
 0x1f5   :  { %vm1511_vm8 = vmand %vm1509_vm5, %vm1510_vm6 }
 0x1fa   :  { %v2127_v24 = vpop.eup %2126 }
 0x1fb   :  { %v2129_v25 = vpop.eup %2128  ;;  %v778_v26 = vadd.f32 1.0, %v2127_v24 }
 0x1fc   :  { %v784_v27 = vadd.f32 1.0, %v2129_v25  ;;  %v2131_v28 = vpop.eup %2130 }
 0x1fd   :  { %2134 = vrcp.f32 %v778_v26  ;;  %v2133_v29 = vpop.eup %2132  ;;  %v791_v33 = vadd.f32 1.0, %v2131_v28 }
 0x1fe   :  { %2136 = vrcp.f32 %v784_v27 }
 0x1ff   :  { %2138 = vrcp.f32 %v791_v33 }
 0x207   :  { %v2135_v31 = vpop.eup %2134 }
 0x208   :  { %v2137_v32 = vpop.eup %2136  ;;  %v795_v21 = vmul.f32 %v2135_v31, %v2133_v29 }
 0x209   :  { %v794_v35 = vmul.f32 %v2137_v32, %v77_v30  ;;  %v2139_v37 = vpop.eup %2138 }
 0x20b   :  { %v796_v36 = vadd.f32 %v795_v21, %v794_v35 }
 0x20d   :  { %1533 = vst [vmem:[%s2495_s10 + $0x8] sm:$0xff] %v796_v36  ;;  %2140 = vtanh.f32 %v796_v36 }
 0x217   :  { %v2141_v38 = vpop.eup %2140 }
 0x218   :  { %v798_v39 = vmul.f32 %v2141_v38, %v2139_v37 }
 0x21a   :  { %1661 = vmatmul.mubr.f32.vlgmr.msra.gmra.mrb[6].mxu1 %v798_v39  ;;  %1532 = vst [vmem:[%s2495_s10] sm:$0xff] %v798_v39 }
 0x221   :  { %v79_v34 = vld [vmem:[%s2486_s1 + $0x18] sm:$0xff] }
 0x24b   :  { %v1201_v43 = vpop.f32.mrb[4].mxu0  ;;  %v1272_v44 = vpop.f32.mrb[4].mxu1 }
 0x24c   :  { %v1299_v45 = vadd.f32 %v1282_v41, %v1201_v43  ;;  %v1203_v46 = vpop.f32.mrb[5].mxu0  ;;  %v1274_v47 = vpop.f32.mrb[5].mxu1  ;;  %v1301_v54 = vadd.f32 %v1290_v52, %v1272_v44 }
 0x24d   :  { %v1300_v0 = vadd.f32 %v1286_v42, %v1203_v46  ;;  %v1302_v51 = vadd.f32 %v1294_v50, %v1274_v47 }
 0x24e   :  { %v1555_v48 = vmul.f32 -1.442695, %v1299_v45 }
 0x24f   :  { %v1556_v49 = vmul.f32 -1.442695, %v1300_v0  ;;  %v1557_v53 = vmul.f32 -1.442695, %v1302_v51 }
 0x250   :  { %2142 = vpow2.f32 %v1555_v48 }
 0x251   :  { %2144 = vpow2.f32 %v1556_v49 }
 0x252   :  { %2146 = vpow2.f32 %v1557_v53 }
 0x253   :  { %2148 = vtanh.f32 %v1301_v54 }
 0x25a   :  { %v2143_v60 = vpop.eup %2142 }
 0x25b   :  { %v2145_v56 = vpop.eup %2144  ;;  %v1306_v62 = vadd.f32 1.0, %v2143_v60 }
 0x25c   :  { %v1312_v57 = vadd.f32 1.0, %v2145_v56  ;;  %v2147_v63 = vpop.eup %2146 }
 0x25d   :  { %2150 = vrcp.f32 %v1306_v62  ;;  %v2149_v1 = vpop.eup %2148  ;;  %v1319_v55 = vadd.f32 1.0, %v2147_v63 }
 0x25e   :  { %2152 = vrcp.f32 %v1312_v57 }
 0x25f   :  { %2154 = vrcp.f32 %v1319_v55 }
 0x267   :  { %v2151_v2 = vpop.eup %2150 }
 0x268   :  { %v2153_v3 = vpop.eup %2152  ;;  %v1323_v4 = vmul.f32 %v2151_v2, %v2149_v1 }
 0x269   :  { %v1322_v5 = vmul.f32 %v2153_v3, %v79_v34  ;;  %v2155_v7 = vpop.eup %2154 }
 0x26b   :  { %v1324_v6 = vadd.f32 %v1323_v4, %v1322_v5 }
 0x26d   :  { %1535 = vst [vmem:[%s2495_s10 + $0x18] sm:$0xff] %v1324_v6  ;;  %2156 = vtanh.f32 %v1324_v6 }
 0x277   :  { %v2157_v8 = vpop.eup %2156 }
 0x278   :  { %v1326_v9 = vmul.f32 %v2157_v8, %v2155_v7 }
 0x27a   :  { %1626 = vmatmul.mubr.f32.vlgmr.msra.gmra.mrb[6].mxu0 %v1326_v9  ;;  %1534 = vst [vmem:[%s2495_s10 + $0x10] sm:$0xff] %v1326_v9 }
 0x2ed   :  { %v1495_v59 = vpop.f32.mrb[6].mxu1 }
 0x2ee   :  { %v1662_v10 = vpop.f32.mrb[7].mxu1 }
 0x34d   :  { %v1425_v11 = vpop.f32.mrb[6].mxu0 }
 0x34e   :  { %v1496_v13 = vadd.f32 %v1495_v59, %v1425_v11  ;;  %v1627_v16 = vpop.f32.mrb[7].mxu0 }
 0x350   :  { %v1506_v15 = vadd.f32 %v1558_v12, %v1496_v13 }
 0x352   :  { %v1515_v17 = vand.u32 2147483647, %v1506_v15  ;;  %v1512_v28 = vmax.f32 %v1506_v15, 0.0  ;;  %vm1513_vm9 = vcmp.ne.f32.partialorder %v1506_v15, %v1506_v15 }
 0x354   :  { %v1516_v18 = vsub.f32 0.0, %v1515_v17 }
 0x356   :  { %v1517_v61 = vmul.f32 1.442695, %v1516_v18 }
 0x358   :  { %2158 = vpow2.f32 %v1517_v61 }
 0x362   :  { %v2159_v19 = vpop.eup %2158 }
 0x363   :  { %v1519_v20 = vadd.f32 1.0, %v2159_v19  ;;  %v1522_v22 = vmul.f32 -0.5, %v2159_v19  ;;  %v1525_v24 = vand.u32 2147483647, %v2159_v19 }
 0x365   :  { %2160 = vlog2.f32 %v1519_v20  ;;  %v1523_v23 = vadd.f32 1.0, %v1522_v22  ;;  %vm1526_vm7 = vcmp.lt.f32.partialorder %v1525_v24, 0.0004427343 }
 0x367   :  { %v1524_v27 = vmul.f32 %v2159_v19, %v1523_v23 }
 0x36f   :  { %v2161_v25 = vpop.eup %2160 }
 0x370   :  { %v1521_v26 = vmul.f32 0.6931472, %v2161_v25 }
 0x372   :  { %v1527_v29 = vsel %vm1526_vm7, %v1524_v27, %v1521_v26 }
 0x373   :  { %v1528_v30 = vadd.f32 %v1527_v29, %v1512_v28 }
 0x375   :  { %v1529_v31 = vsel %vm1513_vm9, %v1506_v15, %v1528_v30 }
 0x376   :  { %v1530_v32 = vsel %vm1511_vm8, %v1529_v31, %v1506_v15 }
 0x377   :  { %1531 = vst [vmem:[%s2494_s9] sm:$0xff] %v1530_v32 }
 0x378   :  { %1544 = vsyncpa [#allocation3], 1 }
 0x379   :  { %1545 = vsyncpa [#allocation5], 1 }

</bundles_post_ra>
